<compile_context>
chip_gen: v6e
topology: v6e:2x2x1
jax: 0.10.0
libtpu: 0.0.40
codegen_flags: <defaults>
</compile_context>

<pallas_src>
import functools

import jax
import jax.numpy as jnp
from jax import lax
from jax.experimental import pallas as pl
from jax.experimental.pallas import tpu as pltpu


# ----------------------------- Pallas kernel --------------------------------
def _lstm_kernel(x_ref,          # (S*B, I)   time-major rows: row = t*B + b
                 wih0c_ref,      # (I, 8H)    layer-0 input weight in combined layout
                 wcomb_ref,      # (2H, 8H)   block-diagonal fused recurrent weight
                 bcomb_ref,      # (1, 8H)    fused biases (b0 | b1) in combined layout
                 fcw_ref,        # (O, H)     fc.weight (PyTorch layout)
                 fcb_ref,        # (1, O)     fc.bias
                 out_ref,        # (B, O)
                 state_s,        # VMEM scratch (B, 2H): packed [h0 | h1]
                 *, seq_len, batch, hidden):
    B, S, H = batch, seq_len, hidden
    f32 = jnp.float32

    # Hoisted layer-0 input projection for ALL timesteps (+ both layers' biases).
    # Combined 8H column layout: [i0 f0 o0 | i1 f1 o1 | g0 | g1].  The layer-1 columns
    # of wih0c are zero, so those columns of xproj hold exactly the layer-1 bias b1.
    xproj = (jnp.dot(x_ref[...], wih0c_ref[...], preferred_element_type=f32)
             + bcomb_ref[...])                                  # (S*B, 8H)

    wcomb = wcomb_ref[...]                                      # (2H, 8H)

    def sigmoid1(v):                                            # single-EUP sigmoid
        return 0.5 * jnp.tanh(0.5 * v) + 0.5

    state_s[...] = jnp.zeros_like(state_s)                      # [h0_{-1} | h1_{-2}] = 0
    c0 = jnp.zeros((B, H), f32)
    c1 = jnp.zeros((B, H), f32)
    h1 = jnp.zeros((B, H), f32)

    # Skewed recurrence: iteration s computes layer-0 gates for time s and layer-1
    # gates for time s-1 from ONE MXU dot on the packed state [h0_{s-1} | h1_{s-2}].
    for s in range(S + 1):
        if s == 0:
            pre = xproj[0:B, :]                                 # h0_{-1} = h1_{-1} = 0
        else:
            t0 = min(s, S - 1)                                  # static Python int
            pre = (jnp.dot(state_s[...], wcomb, preferred_element_type=f32)
                   + xproj[t0 * B:(t0 + 1) * B, :])
            # At s == S only the layer-1 columns of `pre` are used; the layer-1
            # columns of any xproj row equal the (constant) layer-1 bias b1.

        sg = sigmoid1(pre[:, 0:6 * H])                          # all 6 sigmoid gates
        gg = jnp.tanh(pre[:, 6 * H:8 * H])                      # g0 | g1

        if s > 0:                                               # layer-1 update, time s-1
            c1 = sg[:, 4 * H:5 * H] * c1 + sg[:, 3 * H:4 * H] * gg[:, H:2 * H]
            h1 = sg[:, 5 * H:6 * H] * jnp.tanh(c1)
            if s < S:
                state_s[:, H:2 * H] = h1                        # in-place half write
        if s < S:                                               # layer-0 update, time s
            c0 = sg[:, H:2 * H] * c0 + sg[:, 0:H] * gg[:, 0:H]
            state_s[:, 0:H] = sg[:, 2 * H:3 * H] * jnp.tanh(c0)

    # Fused FC head: out = h1_{S-1} @ fc.weight^T + fc.bias.
    fcw = fcw_ref[...]                                          # (O, H)
    if fcw.shape[0] == 1:                                       # O == 1: lane-reduce matvec
        out = jnp.sum(h1 * fcw, axis=-1, keepdims=True)
    else:
        out = lax.dot_general(h1, fcw, (((1,), (1,)), ((), ())),
                              preferred_element_type=f32)
    out_ref[...] = out + fcb_ref[...]


def lstm_forward_pallas(x, params, *, hidden_size, output_size):
    """x: (B, S, I) float32 (batch_first). Returns (B, O) like the PyTorch module."""
    B, S, I = x.shape
    H, O = hidden_size, output_size

    # Time-major flatten so timestep t occupies rows [t*B, (t+1)*B).
    x2d = jnp.transpose(x, (1, 0, 2)).reshape(S * B, I)

    full = lambda shape: pl.BlockSpec(shape, lambda i: (0,) * len(shape))

    return pl.pallas_call(
        functools.partial(_lstm_kernel, seq_len=S, batch=B, hidden=H),
        out_shape=jax.ShapeDtypeStruct((B, O), jnp.float32),
        grid_spec=pltpu.PrefetchScalarGridSpec(
            num_scalar_prefetch=0,
            grid=(1,),                                          # single grid step
            in_specs=[
                full((S * B, I)),                               # whole sequence in VMEM
                full((I, 8 * H)),                               # wih0c
                full((2 * H, 8 * H)),                           # wcomb
                full((1, 8 * H)),                               # bcomb
                full((O, H)),                                   # fc weight
                full((1, O)),                                   # fc bias
            ],
            out_specs=pl.BlockSpec((B, O), lambda i: (0, 0)),
            scratch_shapes=[pltpu.VMEM((B, 2 * H), jnp.float32)],  # packed [h0 | h1]
        ),
        compiler_params=pltpu.CompilerParams(
            dimension_semantics=("arbitrary",)),
    )(x2d, params["wih0c"], params["wcomb"], params["bcomb"],
      params["fcw"], params["fcb"])


# --------------------------- Parameter construction -------------------------
def init_params(key, input_size, hidden_size, output_size):
    """Deterministic init mimicking PyTorch's U(-1/sqrt(H), 1/sqrt(H)); 2 layers."""
    H, I, O = hidden_size, input_size, output_size
    k = 1.0 / jnp.sqrt(jnp.float32(H))
    keys = jax.random.split(key, 10)
    u = lambda kk, shape: jax.random.uniform(kk, shape, jnp.float32, -k, k)

    # PyTorch layout: W_ih (4H, in), W_hh (4H, H), biases (4H,), gate order [i, f, g, o].
    wih0 = u(keys[0], (4 * H, I)); whh0 = u(keys[1], (4 * H, H))
    bih0 = u(keys[2], (4 * H,));   bhh0 = u(keys[3], (4 * H,))
    wih1 = u(keys[4], (4 * H, H)); whh1 = u(keys[5], (4 * H, H))
    bih1 = u(keys[6], (4 * H,));   bhh1 = u(keys[7], (4 * H,))
    fcw = u(keys[8], (O, H));      fcb = u(keys[9], (O,))

    pyt = dict(wih0=wih0, whh0=whh0, bih0=bih0, bhh0=bhh0,
               wih1=wih1, whh1=whh1, bih1=bih1, bhh1=bhh1,
               fcw=fcw, fcb=fcb)

    # Kernel layout: per-layer gate columns reordered [i, f, o, g]; the two layers are
    # fused along an 8H axis as [i0 f0 o0 | i1 f1 o1 | g0 | g1].
    def reorder(wt):                        # wt: (X, 4H), cols [i,f,g,o] -> [i,f,o,g]
        return jnp.concatenate(
            [wt[:, 0:H], wt[:, H:2 * H], wt[:, 3 * H:4 * H], wt[:, 2 * H:3 * H]],
            axis=1)

    w0ih = reorder(wih0.T)                  # (I, 4H)
    w0hh = reorder(whh0.T)                  # (H, 4H)
    w1ih = reorder(wih1.T)                  # (H, 4H)
    w1hh = reorder(whh1.T)                  # (H, 4H)
    b0 = reorder((bih0 + bhh0).reshape(1, 4 * H))
    b1 = reorder((bih1 + bhh1).reshape(1, 4 * H))

    sig, gt = slice(0, 3 * H), slice(3 * H, 4 * H)
    z = lambda r, c: jnp.zeros((r, c), jnp.float32)

    # Layer-0 input weight embedded into the 8H combined layout (layer-1 cols zero).
    wih0c = jnp.concatenate([w0ih[:, sig], z(I, 3 * H), w0ih[:, gt], z(I, H)], axis=1)
    # Block-diagonal fused recurrent weight: rows 0:H <- h0, rows H:2H <- h1.
    wcomb = jnp.concatenate([
        jnp.concatenate([w0hh[:, sig], w1ih[:, sig], w0hh[:, gt], w1ih[:, gt]], axis=1),
        jnp.concatenate([z(H, 3 * H),  w1hh[:, sig], z(H, H),     w1hh[:, gt]], axis=1),
    ], axis=0)                              # (2H, 8H)
    bcomb = jnp.concatenate([b0[:, sig], b1[:, sig], b0[:, gt], b1[:, gt]], axis=1)

    kernel = dict(wih0c=wih0c, wcomb=wcomb, bcomb=bcomb,
                  fcw=fcw, fcb=fcb.reshape(1, O))
    return pyt, kernel


# ------------------------------ JAX reference --------------------------------
def lstm_forward_ref(x, p, hidden_size):
    B, S, I = x.shape
    H = hidden_size

    def cell(x_t, h, c, wih, whh, bih, bhh):
        gates = x_t @ wih.T + bih + h @ whh.T + bhh
        i = jax.nn.sigmoid(gates[:, 0 * H:1 * H])
        f = jax.nn.sigmoid(gates[:, 1 * H:2 * H])
        g = jnp.tanh(gates[:, 2 * H:3 * H])
        o = jax.nn.sigmoid(gates[:, 3 * H:4 * H])
        c_new = f * c + i * g
        h_new = o * jnp.tanh(c_new)
        return h_new, c_new

    def step(carry, x_t):
        h0, c0, h1, c1 = carry
        h0, c0 = cell(x_t, h0, c0, p["wih0"], p["whh0"], p["bih0"], p["bhh0"])
        h1, c1 = cell(h0, h1, c1, p["wih1"], p["whh1"], p["bih1"], p["bhh1"])
        return (h0, c0, h1, c1), h1

    z = jnp.zeros((B, H), jnp.float32)
    (_, _, h1, _), _ = lax.scan(step, (z, z, z, z), jnp.swapaxes(x, 0, 1))
    return h1 @ p["fcw"].T + p["fcb"]


# ----------------------------------- main ------------------------------------
if __name__ == "__main__":
    input_size, hidden_size, num_layers, output_size = 4, 32, 2, 1
    batch, seq = 2, 8
    # TODO(synk): kernel is specialized to num_layers=2 (matches the module's test config).

    key = jax.random.PRNGKey(0)
    kx, kp = jax.random.split(key)
    x = jax.random.normal(kx, (batch, seq, input_size), jnp.float32)
    pyt_params, kernel_params = init_params(kp, input_size, hidden_size, output_size)

    fwd = jax.jit(functools.partial(lstm_forward_pallas,
                                    hidden_size=hidden_size, output_size=output_size))
    out = jax.block_until_ready(fwd(x, kernel_params))

    ref = jax.block_until_ready(lstm_forward_ref(x, pyt_params, hidden_size))
    assert out.shape == (batch, output_size)
    assert jnp.allclose(out, ref, rtol=1e-5, atol=1e-5), (out, ref)

    print("KERNEL_OK")
</pallas_src>

<mosaic_0001>
module attributes {stable_mosaic.version = 11 : i64} {
  func.func @_lstm_kernel(%arg0: i32, %arg1: memref<16x4xf32, #tpu.memory_space<vmem>>, %arg2: memref<4x256xf32, #tpu.memory_space<vmem>>, %arg3: memref<64x256xf32, #tpu.memory_space<vmem>>, %arg4: memref<1x256xf32, #tpu.memory_space<vmem>>, %arg5: memref<1x32xf32, #tpu.memory_space<vmem>>, %arg6: memref<1x1xf32, #tpu.memory_space<vmem>>, %arg7: memref<2x1xf32, #tpu.memory_space<vmem>>, %arg8: memref<2x64xf32, #tpu.memory_space<vmem>>) attributes {dimension_semantics = [#tpu.dimension_semantics<arbitrary>], iteration_bounds = array<i64: 1>, scalar_prefetch = 0 : i64, scratch_operands = 1 : i64, tpu.core_type = #tpu.core_type<tc>, window_params = [{pipeline_mode = #tpu.pipeline_mode<synchronous>, transform_indices = @transform_0, window_bounds = array<i64: 16, 4>}, {pipeline_mode = #tpu.pipeline_mode<synchronous>, transform_indices = @transform_1, window_bounds = array<i64: 4, 256>}, {pipeline_mode = #tpu.pipeline_mode<synchronous>, transform_indices = @transform_2, window_bounds = array<i64: 64, 256>}, {pipeline_mode = #tpu.pipeline_mode<synchronous>, transform_indices = @transform_3, window_bounds = array<i64: 1, 256>}, {pipeline_mode = #tpu.pipeline_mode<synchronous>, transform_indices = @transform_4, window_bounds = array<i64: 1, 32>}, {pipeline_mode = #tpu.pipeline_mode<synchronous>, transform_indices = @transform_5, window_bounds = array<i64: 1, 1>}, {pipeline_mode = #tpu.pipeline_mode<synchronous>, transform_indices = @transform_6, window_bounds = array<i64: 2, 1>}]} {
    %c0 = arith.constant 0 : index
    %c0_0 = arith.constant 0 : index
    %0 = vector.load %arg1[%c0, %c0_0] : memref<16x4xf32, #tpu.memory_space<vmem>>, vector<16x4xf32>
    %c0_1 = arith.constant 0 : index
    %c0_2 = arith.constant 0 : index
    %1 = vector.load %arg2[%c0_1, %c0_2] : memref<4x256xf32, #tpu.memory_space<vmem>>, vector<4x256xf32>
    %cst = arith.constant dense<0.000000e+00> : vector<16x256xf32>
    %2 = tpu.matmul %0, %1, %cst {dimension_numbers = #tpu.dot_dimension_numbers<[1], [0], [0], [1], [0, 0, 1, 1], [], []>} : vector<16x4xf32>, vector<4x256xf32>, vector<16x256xf32> -> vector<16x256xf32>
    %c0_3 = arith.constant 0 : index
    %c0_4 = arith.constant 0 : index
    %3 = vector.load %arg4[%c0_3, %c0_4] : memref<1x256xf32, #tpu.memory_space<vmem>>, vector<1x256xf32>
    %4 = vector.broadcast %3 : vector<1x256xf32> to vector<16x256xf32>
    %5 = arith.addf %2, %4 : vector<16x256xf32>
    %c0_5 = arith.constant 0 : index
    %c0_6 = arith.constant 0 : index
    %6 = vector.load %arg3[%c0_5, %c0_6] : memref<64x256xf32, #tpu.memory_space<vmem>>, vector<64x256xf32>
    %cst_7 = arith.constant 0.000000e+00 : f32
    %7 = vector.broadcast %cst_7 : f32 to vector<2x64xf32>
    %c0_8 = arith.constant 0 : index
    %c0_9 = arith.constant 0 : index
    %8 = vector.load %arg8[%c0_8, %c0_9] : memref<2x64xf32, #tpu.memory_space<vmem>>, vector<2x64xf32>
    tpu.vector_store %arg8[%c0_8, %c0_9], %7 {strides = array<i32>} : memref<2x64xf32, #tpu.memory_space<vmem>>, vector<2x64xf32>,
    %cst_10 = arith.constant 0.000000e+00 : f32
    %9 = vector.broadcast %cst_10 : f32 to vector<2x32xf32>
    %cst_11 = arith.constant 0.000000e+00 : f32
    %10 = vector.broadcast %cst_11 : f32 to vector<2x32xf32>
    %11 = vector.extract_strided_slice %5 {offsets = [0, 0], sizes = [2, 256], strides = [1, 1]} : vector<16x256xf32> to vector<2x256xf32>
    %12 = vector.extract_strided_slice %11 {offsets = [0, 0], sizes = [2, 192], strides = [1, 1]} : vector<2x256xf32> to vector<2x192xf32>
    %cst_12 = arith.constant 5.000000e-01 : f32
    %13 = vector.broadcast %cst_12 : f32 to vector<2x192xf32>
    %14 = arith.mulf %13, %12 : vector<2x192xf32>
    %15 = math.tanh %14 : vector<2x192xf32>
    %cst_13 = arith.constant 5.000000e-01 : f32
    %16 = vector.broadcast %cst_13 : f32 to vector<2x192xf32>
    %17 = arith.mulf %16, %15 : vector<2x192xf32>
    %cst_14 = arith.constant 5.000000e-01 : f32
    %18 = vector.broadcast %cst_14 : f32 to vector<2x192xf32>
    %19 = arith.addf %17, %18 : vector<2x192xf32>
    %20 = vector.extract_strided_slice %11 {offsets = [0, 192], sizes = [2, 64], strides = [1, 1]} : vector<2x256xf32> to vector<2x64xf32>
    %21 = math.tanh %20 : vector<2x64xf32>
    %22 = vector.extract_strided_slice %19 {offsets = [0, 32], sizes = [2, 32], strides = [1, 1]} : vector<2x192xf32> to vector<2x32xf32>
    %23 = arith.mulf %22, %9 : vector<2x32xf32>
    %24 = vector.extract_strided_slice %19 {offsets = [0, 0], sizes = [2, 32], strides = [1, 1]} : vector<2x192xf32> to vector<2x32xf32>
    %25 = vector.extract_strided_slice %21 {offsets = [0, 0], sizes = [2, 32], strides = [1, 1]} : vector<2x64xf32> to vector<2x32xf32>
    %26 = arith.mulf %24, %25 : vector<2x32xf32>
    %27 = arith.addf %23, %26 : vector<2x32xf32>
    %28 = vector.extract_strided_slice %19 {offsets = [0, 64], sizes = [2, 32], strides = [1, 1]} : vector<2x192xf32> to vector<2x32xf32>
    %29 = math.tanh %27 : vector<2x32xf32>
    %30 = arith.mulf %28, %29 : vector<2x32xf32>
    %c0_15 = arith.constant 0 : index
    %c0_16 = arith.constant 0 : index
    %31 = vector.load %arg8[%c0_15, %c0_16] : memref<2x64xf32, #tpu.memory_space<vmem>>, vector<2x32xf32>
    tpu.vector_store %arg8[%c0_15, %c0_16], %30 {strides = array<i32>} : memref<2x64xf32, #tpu.memory_space<vmem>>, vector<2x32xf32>,
    %c0_17 = arith.constant 0 : index
    %c0_18 = arith.constant 0 : index
    %32 = vector.load %arg8[%c0_17, %c0_18] : memref<2x64xf32, #tpu.memory_space<vmem>>, vector<2x64xf32>
    %cst_19 = arith.constant dense<0.000000e+00> : vector<2x256xf32>
    %33 = tpu.matmul %32, %6, %cst_19 {dimension_numbers = #tpu.dot_dimension_numbers<[1], [0], [0], [1], [0, 0, 1, 1], [], []>} : vector<2x64xf32>, vector<64x256xf32>, vector<2x256xf32> -> vector<2x256xf32>
    %34 = vector.extract_strided_slice %5 {offsets = [2, 0], sizes = [2, 256], strides = [1, 1]} : vector<16x256xf32> to vector<2x256xf32>
    %35 = arith.addf %33, %34 : vector<2x256xf32>
    %36 = vector.extract_strided_slice %35 {offsets = [0, 0], sizes = [2, 192], strides = [1, 1]} : vector<2x256xf32> to vector<2x192xf32>
    %cst_20 = arith.constant 5.000000e-01 : f32
    %37 = vector.broadcast %cst_20 : f32 to vector<2x192xf32>
    %38 = arith.mulf %37, %36 : vector<2x192xf32>
    %39 = math.tanh %38 : vector<2x192xf32>
    %cst_21 = arith.constant 5.000000e-01 : f32
    %40 = vector.broadcast %cst_21 : f32 to vector<2x192xf32>
    %41 = arith.mulf %40, %39 : vector<2x192xf32>
    %cst_22 = arith.constant 5.000000e-01 : f32
    %42 = vector.broadcast %cst_22 : f32 to vector<2x192xf32>
    %43 = arith.addf %41, %42 : vector<2x192xf32>
    %44 = vector.extract_strided_slice %35 {offsets = [0, 192], sizes = [2, 64], strides = [1, 1]} : vector<2x256xf32> to vector<2x64xf32>
    %45 = math.tanh %44 : vector<2x64xf32>
    %46 = vector.extract_strided_slice %43 {offsets = [0, 128], sizes = [2, 32], strides = [1, 1]} : vector<2x192xf32> to vector<2x32xf32>
    %47 = arith.mulf %46, %10 : vector<2x32xf32>
    %48 = vector.extract_strided_slice %43 {offsets = [0, 96], sizes = [2, 32], strides = [1, 1]} : vector<2x192xf32> to vector<2x32xf32>
    %49 = vector.extract_strided_slice %45 {offsets = [0, 32], sizes = [2, 32], strides = [1, 1]} : vector<2x64xf32> to vector<2x32xf32>
    %50 = arith.mulf %48, %49 : vector<2x32xf32>
    %51 = arith.addf %47, %50 : vector<2x32xf32>
    %52 = vector.extract_strided_slice %43 {offsets = [0, 160], sizes = [2, 32], strides = [1, 1]} : vector<2x192xf32> to vector<2x32xf32>
    %53 = math.tanh %51 : vector<2x32xf32>
    %54 = arith.mulf %52, %53 : vector<2x32xf32>
    %c0_23 = arith.constant 0 : index
    %c32 = arith.constant 32 : index
    %55 = vector.load %arg8[%c0_23, %c32] : memref<2x64xf32, #tpu.memory_space<vmem>>, vector<2x32xf32>
    tpu.vector_store %arg8[%c0_23, %c32], %54 {strides = array<i32>} : memref<2x64xf32, #tpu.memory_space<vmem>>, vector<2x32xf32>,
    %56 = vector.extract_strided_slice %43 {offsets = [0, 32], sizes = [2, 32], strides = [1, 1]} : vector<2x192xf32> to vector<2x32xf32>
    %57 = arith.mulf %56, %27 : vector<2x32xf32>
    %58 = vector.extract_strided_slice %43 {offsets = [0, 0], sizes = [2, 32], strides = [1, 1]} : vector<2x192xf32> to vector<2x32xf32>
    %59 = vector.extract_strided_slice %45 {offsets = [0, 0], sizes = [2, 32], strides = [1, 1]} : vector<2x64xf32> to vector<2x32xf32>
    %60 = arith.mulf %58, %59 : vector<2x32xf32>
    %61 = arith.addf %57, %60 : vector<2x32xf32>
    %62 = vector.extract_strided_slice %43 {offsets = [0, 64], sizes = [2, 32], strides = [1, 1]} : vector<2x192xf32> to vector<2x32xf32>
    %63 = math.tanh %61 : vector<2x32xf32>
    %64 = arith.mulf %62, %63 : vector<2x32xf32>
    %c0_24 = arith.constant 0 : index
    %c0_25 = arith.constant 0 : index
    %65 = vector.load %arg8[%c0_24, %c0_25] : memref<2x64xf32, #tpu.memory_space<vmem>>, vector<2x32xf32>
    tpu.vector_store %arg8[%c0_24, %c0_25], %64 {strides = array<i32>} : memref<2x64xf32, #tpu.memory_space<vmem>>, vector<2x32xf32>,
    %c0_26 = arith.constant 0 : index
    %c0_27 = arith.constant 0 : index
    %66 = vector.load %arg8[%c0_26, %c0_27] : memref<2x64xf32, #tpu.memory_space<vmem>>, vector<2x64xf32>
    %cst_28 = arith.constant dense<0.000000e+00> : vector<2x256xf32>
    %67 = tpu.matmul %66, %6, %cst_28 {dimension_numbers = #tpu.dot_dimension_numbers<[1], [0], [0], [1], [0, 0, 1, 1], [], []>} : vector<2x64xf32>, vector<64x256xf32>, vector<2x256xf32> -> vector<2x256xf32>
    %68 = vector.extract_strided_slice %5 {offsets = [4, 0], sizes = [2, 256], strides = [1, 1]} : vector<16x256xf32> to vector<2x256xf32>
    %69 = arith.addf %67, %68 : vector<2x256xf32>
    %70 = vector.extract_strided_slice %69 {offsets = [0, 0], sizes = [2, 192], strides = [1, 1]} : vector<2x256xf32> to vector<2x192xf32>
    %cst_29 = arith.constant 5.000000e-01 : f32
    %71 = vector.broadcast %cst_29 : f32 to vector<2x192xf32>
    %72 = arith.mulf %71, %70 : vector<2x192xf32>
    %73 = math.tanh %72 : vector<2x192xf32>
    %cst_30 = arith.constant 5.000000e-01 : f32
    %74 = vector.broadcast %cst_30 : f32 to vector<2x192xf32>
    %75 = arith.mulf %74, %73 : vector<2x192xf32>
    %cst_31 = arith.constant 5.000000e-01 : f32
    %76 = vector.broadcast %cst_31 : f32 to vector<2x192xf32>
    %77 = arith.addf %75, %76 : vector<2x192xf32>
    %78 = vector.extract_strided_slice %69 {offsets = [0, 192], sizes = [2, 64], strides = [1, 1]} : vector<2x256xf32> to vector<2x64xf32>
    %79 = math.tanh %78 : vector<2x64xf32>
    %80 = vector.extract_strided_slice %77 {offsets = [0, 128], sizes = [2, 32], strides = [1, 1]} : vector<2x192xf32> to vector<2x32xf32>
    %81 = arith.mulf %80, %51 : vector<2x32xf32>
    %82 = vector.extract_strided_slice %77 {offsets = [0, 96], sizes = [2, 32], strides = [1, 1]} : vector<2x192xf32> to vector<2x32xf32>
    %83 = vector.extract_strided_slice %79 {offsets = [0, 32], sizes = [2, 32], strides = [1, 1]} : vector<2x64xf32> to vector<2x32xf32>
    %84 = arith.mulf %82, %83 : vector<2x32xf32>
    %85 = arith.addf %81, %84 : vector<2x32xf32>
    %86 = vector.extract_strided_slice %77 {offsets = [0, 160], sizes = [2, 32], strides = [1, 1]} : vector<2x192xf32> to vector<2x32xf32>
    %87 = math.tanh %85 : vector<2x32xf32>
    %88 = arith.mulf %86, %87 : vector<2x32xf32>
    %c0_32 = arith.constant 0 : index
    %c32_33 = arith.constant 32 : index
    %89 = vector.load %arg8[%c0_32, %c32_33] : memref<2x64xf32, #tpu.memory_space<vmem>>, vector<2x32xf32>
    tpu.vector_store %arg8[%c0_32, %c32_33], %88 {strides = array<i32>} : memref<2x64xf32, #tpu.memory_space<vmem>>, vector<2x32xf32>,
    %90 = vector.extract_strided_slice %77 {offsets = [0, 32], sizes = [2, 32], strides = [1, 1]} : vector<2x192xf32> to vector<2x32xf32>
    %91 = arith.mulf %90, %61 : vector<2x32xf32>
    %92 = vector.extract_strided_slice %77 {offsets = [0, 0], sizes = [2, 32], strides = [1, 1]} : vector<2x192xf32> to vector<2x32xf32>
    %93 = vector.extract_strided_slice %79 {offsets = [0, 0], sizes = [2, 32], strides = [1, 1]} : vector<2x64xf32> to vector<2x32xf32>
    %94 = arith.mulf %92, %93 : vector<2x32xf32>
    %95 = arith.addf %91, %94 : vector<2x32xf32>
    %96 = vector.extract_strided_slice %77 {offsets = [0, 64], sizes = [2, 32], strides = [1, 1]} : vector<2x192xf32> to vector<2x32xf32>
    %97 = math.tanh %95 : vector<2x32xf32>
    %98 = arith.mulf %96, %97 : vector<2x32xf32>
    %c0_34 = arith.constant 0 : index
    %c0_35 = arith.constant 0 : index
    %99 = vector.load %arg8[%c0_34, %c0_35] : memref<2x64xf32, #tpu.memory_space<vmem>>, vector<2x32xf32>
    tpu.vector_store %arg8[%c0_34, %c0_35], %98 {strides = array<i32>} : memref<2x64xf32, #tpu.memory_space<vmem>>, vector<2x32xf32>,
    %c0_36 = arith.constant 0 : index
    %c0_37 = arith.constant 0 : index
    %100 = vector.load %arg8[%c0_36, %c0_37] : memref<2x64xf32, #tpu.memory_space<vmem>>, vector<2x64xf32>
    %cst_38 = arith.constant dense<0.000000e+00> : vector<2x256xf32>
    %101 = tpu.matmul %100, %6, %cst_38 {dimension_numbers = #tpu.dot_dimension_numbers<[1], [0], [0], [1], [0, 0, 1, 1], [], []>} : vector<2x64xf32>, vector<64x256xf32>, vector<2x256xf32> -> vector<2x256xf32>
    %102 = vector.extract_strided_slice %5 {offsets = [6, 0], sizes = [2, 256], strides = [1, 1]} : vector<16x256xf32> to vector<2x256xf32>
    %103 = arith.addf %101, %102 : vector<2x256xf32>
    %104 = vector.extract_strided_slice %103 {offsets = [0, 0], sizes = [2, 192], strides = [1, 1]} : vector<2x256xf32> to vector<2x192xf32>
    %cst_39 = arith.constant 5.000000e-01 : f32
    %105 = vector.broadcast %cst_39 : f32 to vector<2x192xf32>
    %106 = arith.mulf %105, %104 : vector<2x192xf32>
    %107 = math.tanh %106 : vector<2x192xf32>
    %cst_40 = arith.constant 5.000000e-01 : f32
    %108 = vector.broadcast %cst_40 : f32 to vector<2x192xf32>
    %109 = arith.mulf %108, %107 : vector<2x192xf32>
    %cst_41 = arith.constant 5.000000e-01 : f32
    %110 = vector.broadcast %cst_41 : f32 to vector<2x192xf32>
    %111 = arith.addf %109, %110 : vector<2x192xf32>
    %112 = vector.extract_strided_slice %103 {offsets = [0, 192], sizes = [2, 64], strides = [1, 1]} : vector<2x256xf32> to vector<2x64xf32>
    %113 = math.tanh %112 : vector<2x64xf32>
    %114 = vector.extract_strided_slice %111 {offsets = [0, 128], sizes = [2, 32], strides = [1, 1]} : vector<2x192xf32> to vector<2x32xf32>
    %115 = arith.mulf %114, %85 : vector<2x32xf32>
    %116 = vector.extract_strided_slice %111 {offsets = [0, 96], sizes = [2, 32], strides = [1, 1]} : vector<2x192xf32> to vector<2x32xf32>
    %117 = vector.extract_strided_slice %113 {offsets = [0, 32], sizes = [2, 32], strides = [1, 1]} : vector<2x64xf32> to vector<2x32xf32>
    %118 = arith.mulf %116, %117 : vector<2x32xf32>
    %119 = arith.addf %115, %118 : vector<2x32xf32>
    %120 = vector.extract_strided_slice %111 {offsets = [0, 160], sizes = [2, 32], strides = [1, 1]} : vector<2x192xf32> to vector<2x32xf32>
    %121 = math.tanh %119 : vector<2x32xf32>
    %122 = arith.mulf %120, %121 : vector<2x32xf32>
    %c0_42 = arith.constant 0 : index
    %c32_43 = arith.constant 32 : index
    %123 = vector.load %arg8[%c0_42, %c32_43] : memref<2x64xf32, #tpu.memory_space<vmem>>, vector<2x32xf32>
    tpu.vector_store %arg8[%c0_42, %c32_43], %122 {strides = array<i32>} : memref<2x64xf32, #tpu.memory_space<vmem>>, vector<2x32xf32>,
    %124 = vector.extract_strided_slice %111 {offsets = [0, 32], sizes = [2, 32], strides = [1, 1]} : vector<2x192xf32> to vector<2x32xf32>
    %125 = arith.mulf %124, %95 : vector<2x32xf32>
    %126 = vector.extract_strided_slice %111 {offsets = [0, 0], sizes = [2, 32], strides = [1, 1]} : vector<2x192xf32> to vector<2x32xf32>
    %127 = vector.extract_strided_slice %113 {offsets = [0, 0], sizes = [2, 32], strides = [1, 1]} : vector<2x64xf32> to vector<2x32xf32>
    %128 = arith.mulf %126, %127 : vector<2x32xf32>
    %129 = arith.addf %125, %128 : vector<2x32xf32>
    %130 = vector.extract_strided_slice %111 {offsets = [0, 64], sizes = [2, 32], strides = [1, 1]} : vector<2x192xf32> to vector<2x32xf32>
    %131 = math.tanh %129 : vector<2x32xf32>
    %132 = arith.mulf %130, %131 : vector<2x32xf32>
    %c0_44 = arith.constant 0 : index
    %c0_45 = arith.constant 0 : index
    %133 = vector.load %arg8[%c0_44, %c0_45] : memref<2x64xf32, #tpu.memory_space<vmem>>, vector<2x32xf32>
    tpu.vector_store %arg8[%c0_44, %c0_45], %132 {strides = array<i32>} : memref<2x64xf32, #tpu.memory_space<vmem>>, vector<2x32xf32>,
    %c0_46 = arith.constant 0 : index
    %c0_47 = arith.constant 0 : index
    %134 = vector.load %arg8[%c0_46, %c0_47] : memref<2x64xf32, #tpu.memory_space<vmem>>, vector<2x64xf32>
    %cst_48 = arith.constant dense<0.000000e+00> : vector<2x256xf32>
    %135 = tpu.matmul %134, %6, %cst_48 {dimension_numbers = #tpu.dot_dimension_numbers<[1], [0], [0], [1], [0, 0, 1, 1], [], []>} : vector<2x64xf32>, vector<64x256xf32>, vector<2x256xf32> -> vector<2x256xf32>
    %136 = vector.extract_strided_slice %5 {offsets = [8, 0], sizes = [2, 256], strides = [1, 1]} : vector<16x256xf32> to vector<2x256xf32>
    %137 = arith.addf %135, %136 : vector<2x256xf32>
    %138 = vector.extract_strided_slice %137 {offsets = [0, 0], sizes = [2, 192], strides = [1, 1]} : vector<2x256xf32> to vector<2x192xf32>
    %cst_49 = arith.constant 5.000000e-01 : f32
    %139 = vector.broadcast %cst_49 : f32 to vector<2x192xf32>
    %140 = arith.mulf %139, %138 : vector<2x192xf32>
    %141 = math.tanh %140 : vector<2x192xf32>
    %cst_50 = arith.constant 5.000000e-01 : f32
    %142 = vector.broadcast %cst_50 : f32 to vector<2x192xf32>
    %143 = arith.mulf %142, %141 : vector<2x192xf32>
    %cst_51 = arith.constant 5.000000e-01 : f32
    %144 = vector.broadcast %cst_51 : f32 to vector<2x192xf32>
    %145 = arith.addf %143, %144 : vector<2x192xf32>
    %146 = vector.extract_strided_slice %137 {offsets = [0, 192], sizes = [2, 64], strides = [1, 1]} : vector<2x256xf32> to vector<2x64xf32>
    %147 = math.tanh %146 : vector<2x64xf32>
    %148 = vector.extract_strided_slice %145 {offsets = [0, 128], sizes = [2, 32], strides = [1, 1]} : vector<2x192xf32> to vector<2x32xf32>
    %149 = arith.mulf %148, %119 : vector<2x32xf32>
    %150 = vector.extract_strided_slice %145 {offsets = [0, 96], sizes = [2, 32], strides = [1, 1]} : vector<2x192xf32> to vector<2x32xf32>
    %151 = vector.extract_strided_slice %147 {offsets = [0, 32], sizes = [2, 32], strides = [1, 1]} : vector<2x64xf32> to vector<2x32xf32>
    %152 = arith.mulf %150, %151 : vector<2x32xf32>
    %153 = arith.addf %149, %152 : vector<2x32xf32>
    %154 = vector.extract_strided_slice %145 {offsets = [0, 160], sizes = [2, 32], strides = [1, 1]} : vector<2x192xf32> to vector<2x32xf32>
    %155 = math.tanh %153 : vector<2x32xf32>
    %156 = arith.mulf %154, %155 : vector<2x32xf32>
    %c0_52 = arith.constant 0 : index
    %c32_53 = arith.constant 32 : index
    %157 = vector.load %arg8[%c0_52, %c32_53] : memref<2x64xf32, #tpu.memory_space<vmem>>, vector<2x32xf32>
    tpu.vector_store %arg8[%c0_52, %c32_53], %156 {strides = array<i32>} : memref<2x64xf32, #tpu.memory_space<vmem>>, vector<2x32xf32>,
    %158 = vector.extract_strided_slice %145 {offsets = [0, 32], sizes = [2, 32], strides = [1, 1]} : vector<2x192xf32> to vector<2x32xf32>
    %159 = arith.mulf %158, %129 : vector<2x32xf32>
    %160 = vector.extract_strided_slice %145 {offsets = [0, 0], sizes = [2, 32], strides = [1, 1]} : vector<2x192xf32> to vector<2x32xf32>
    %161 = vector.extract_strided_slice %147 {offsets = [0, 0], sizes = [2, 32], strides = [1, 1]} : vector<2x64xf32> to vector<2x32xf32>
    %162 = arith.mulf %160, %161 : vector<2x32xf32>
    %163 = arith.addf %159, %162 : vector<2x32xf32>
    %164 = vector.extract_strided_slice %145 {offsets = [0, 64], sizes = [2, 32], strides = [1, 1]} : vector<2x192xf32> to vector<2x32xf32>
    %165 = math.tanh %163 : vector<2x32xf32>
    %166 = arith.mulf %164, %165 : vector<2x32xf32>
    %c0_54 = arith.constant 0 : index
    %c0_55 = arith.constant 0 : index
    %167 = vector.load %arg8[%c0_54, %c0_55] : memref<2x64xf32, #tpu.memory_space<vmem>>, vector<2x32xf32>
    tpu.vector_store %arg8[%c0_54, %c0_55], %166 {strides = array<i32>} : memref<2x64xf32, #tpu.memory_space<vmem>>, vector<2x32xf32>,
    %c0_56 = arith.constant 0 : index
    %c0_57 = arith.constant 0 : index
    %168 = vector.load %arg8[%c0_56, %c0_57] : memref<2x64xf32, #tpu.memory_space<vmem>>, vector<2x64xf32>
    %cst_58 = arith.constant dense<0.000000e+00> : vector<2x256xf32>
    %169 = tpu.matmul %168, %6, %cst_58 {dimension_numbers = #tpu.dot_dimension_numbers<[1], [0], [0], [1], [0, 0, 1, 1], [], []>} : vector<2x64xf32>, vector<64x256xf32>, vector<2x256xf32> -> vector<2x256xf32>
    %170 = vector.extract_strided_slice %5 {offsets = [10, 0], sizes = [2, 256], strides = [1, 1]} : vector<16x256xf32> to vector<2x256xf32>
    %171 = arith.addf %169, %170 : vector<2x256xf32>
    %172 = vector.extract_strided_slice %171 {offsets = [0, 0], sizes = [2, 192], strides = [1, 1]} : vector<2x256xf32> to vector<2x192xf32>
    %cst_59 = arith.constant 5.000000e-01 : f32
    %173 = vector.broadcast %cst_59 : f32 to vector<2x192xf32>
    %174 = arith.mulf %173, %172 : vector<2x192xf32>
    %175 = math.tanh %174 : vector<2x192xf32>
    %cst_60 = arith.constant 5.000000e-01 : f32
    %176 = vector.broadcast %cst_60 : f32 to vector<2x192xf32>
    %177 = arith.mulf %176, %175 : vector<2x192xf32>
    %cst_61 = arith.constant 5.000000e-01 : f32
    %178 = vector.broadcast %cst_61 : f32 to vector<2x192xf32>
    %179 = arith.addf %177, %178 : vector<2x192xf32>
    %180 = vector.extract_strided_slice %171 {offsets = [0, 192], sizes = [2, 64], strides = [1, 1]} : vector<2x256xf32> to vector<2x64xf32>
    %181 = math.tanh %180 : vector<2x64xf32>
    %182 = vector.extract_strided_slice %179 {offsets = [0, 128], sizes = [2, 32], strides = [1, 1]} : vector<2x192xf32> to vector<2x32xf32>
    %183 = arith.mulf %182, %153 : vector<2x32xf32>
    %184 = vector.extract_strided_slice %179 {offsets = [0, 96], sizes = [2, 32], strides = [1, 1]} : vector<2x192xf32> to vector<2x32xf32>
    %185 = vector.extract_strided_slice %181 {offsets = [0, 32], sizes = [2, 32], strides = [1, 1]} : vector<2x64xf32> to vector<2x32xf32>
    %186 = arith.mulf %184, %185 : vector<2x32xf32>
    %187 = arith.addf %183, %186 : vector<2x32xf32>
    %188 = vector.extract_strided_slice %179 {offsets = [0, 160], sizes = [2, 32], strides = [1, 1]} : vector<2x192xf32> to vector<2x32xf32>
    %189 = math.tanh %187 : vector<2x32xf32>
    %190 = arith.mulf %188, %189 : vector<2x32xf32>
    %c0_62 = arith.constant 0 : index
    %c32_63 = arith.constant 32 : index
    %191 = vector.load %arg8[%c0_62, %c32_63] : memref<2x64xf32, #tpu.memory_space<vmem>>, vector<2x32xf32>
    tpu.vector_store %arg8[%c0_62, %c32_63], %190 {strides = array<i32>} : memref<2x64xf32, #tpu.memory_space<vmem>>, vector<2x32xf32>,
    %192 = vector.extract_strided_slice %179 {offsets = [0, 32], sizes = [2, 32], strides = [1, 1]} : vector<2x192xf32> to vector<2x32xf32>
    %193 = arith.mulf %192, %163 : vector<2x32xf32>
    %194 = vector.extract_strided_slice %179 {offsets = [0, 0], sizes = [2, 32], strides = [1, 1]} : vector<2x192xf32> to vector<2x32xf32>
    %195 = vector.extract_strided_slice %181 {offsets = [0, 0], sizes = [2, 32], strides = [1, 1]} : vector<2x64xf32> to vector<2x32xf32>
    %196 = arith.mulf %194, %195 : vector<2x32xf32>
    %197 = arith.addf %193, %196 : vector<2x32xf32>
    %198 = vector.extract_strided_slice %179 {offsets = [0, 64], sizes = [2, 32], strides = [1, 1]} : vector<2x192xf32> to vector<2x32xf32>
    %199 = math.tanh %197 : vector<2x32xf32>
    %200 = arith.mulf %198, %199 : vector<2x32xf32>
    %c0_64 = arith.constant 0 : index
    %c0_65 = arith.constant 0 : index
    %201 = vector.load %arg8[%c0_64, %c0_65] : memref<2x64xf32, #tpu.memory_space<vmem>>, vector<2x32xf32>
    tpu.vector_store %arg8[%c0_64, %c0_65], %200 {strides = array<i32>} : memref<2x64xf32, #tpu.memory_space<vmem>>, vector<2x32xf32>,
    %c0_66 = arith.constant 0 : index
    %c0_67 = arith.constant 0 : index
    %202 = vector.load %arg8[%c0_66, %c0_67] : memref<2x64xf32, #tpu.memory_space<vmem>>, vector<2x64xf32>
    %cst_68 = arith.constant dense<0.000000e+00> : vector<2x256xf32>
    %203 = tpu.matmul %202, %6, %cst_68 {dimension_numbers = #tpu.dot_dimension_numbers<[1], [0], [0], [1], [0, 0, 1, 1], [], []>} : vector<2x64xf32>, vector<64x256xf32>, vector<2x256xf32> -> vector<2x256xf32>
    %204 = vector.extract_strided_slice %5 {offsets = [12, 0], sizes = [2, 256], strides = [1, 1]} : vector<16x256xf32> to vector<2x256xf32>
    %205 = arith.addf %203, %204 : vector<2x256xf32>
    %206 = vector.extract_strided_slice %205 {offsets = [0, 0], sizes = [2, 192], strides = [1, 1]} : vector<2x256xf32> to vector<2x192xf32>
    %cst_69 = arith.constant 5.000000e-01 : f32
    %207 = vector.broadcast %cst_69 : f32 to vector<2x192xf32>
    %208 = arith.mulf %207, %206 : vector<2x192xf32>
    %209 = math.tanh %208 : vector<2x192xf32>
    %cst_70 = arith.constant 5.000000e-01 : f32
    %210 = vector.broadcast %cst_70 : f32 to vector<2x192xf32>
    %211 = arith.mulf %210, %209 : vector<2x192xf32>
    %cst_71 = arith.constant 5.000000e-01 : f32
    %212 = vector.broadcast %cst_71 : f32 to vector<2x192xf32>
    %213 = arith.addf %211, %212 : vector<2x192xf32>
    %214 = vector.extract_strided_slice %205 {offsets = [0, 192], sizes = [2, 64], strides = [1, 1]} : vector<2x256xf32> to vector<2x64xf32>
    %215 = math.tanh %214 : vector<2x64xf32>
    %216 = vector.extract_strided_slice %213 {offsets = [0, 128], sizes = [2, 32], strides = [1, 1]} : vector<2x192xf32> to vector<2x32xf32>
    %217 = arith.mulf %216, %187 : vector<2x32xf32>
    %218 = vector.extract_strided_slice %213 {offsets = [0, 96], sizes = [2, 32], strides = [1, 1]} : vector<2x192xf32> to vector<2x32xf32>
    %219 = vector.extract_strided_slice %215 {offsets = [0, 32], sizes = [2, 32], strides = [1, 1]} : vector<2x64xf32> to vector<2x32xf32>
    %220 = arith.mulf %218, %219 : vector<2x32xf32>
    %221 = arith.addf %217, %220 : vector<2x32xf32>
    %222 = vector.extract_strided_slice %213 {offsets = [0, 160], sizes = [2, 32], strides = [1, 1]} : vector<2x192xf32> to vector<2x32xf32>
    %223 = math.tanh %221 : vector<2x32xf32>
    %224 = arith.mulf %222, %223 : vector<2x32xf32>
    %c0_72 = arith.constant 0 : index
    %c32_73 = arith.constant 32 : index
    %225 = vector.load %arg8[%c0_72, %c32_73] : memref<2x64xf32, #tpu.memory_space<vmem>>, vector<2x32xf32>
    tpu.vector_store %arg8[%c0_72, %c32_73], %224 {strides = array<i32>} : memref<2x64xf32, #tpu.memory_space<vmem>>, vector<2x32xf32>,
    %226 = vector.extract_strided_slice %213 {offsets = [0, 32], sizes = [2, 32], strides = [1, 1]} : vector<2x192xf32> to vector<2x32xf32>
    %227 = arith.mulf %226, %197 : vector<2x32xf32>
    %228 = vector.extract_strided_slice %213 {offsets = [0, 0], sizes = [2, 32], strides = [1, 1]} : vector<2x192xf32> to vector<2x32xf32>
    %229 = vector.extract_strided_slice %215 {offsets = [0, 0], sizes = [2, 32], strides = [1, 1]} : vector<2x64xf32> to vector<2x32xf32>
    %230 = arith.mulf %228, %229 : vector<2x32xf32>
    %231 = arith.addf %227, %230 : vector<2x32xf32>
    %232 = vector.extract_strided_slice %213 {offsets = [0, 64], sizes = [2, 32], strides = [1, 1]} : vector<2x192xf32> to vector<2x32xf32>
    %233 = math.tanh %231 : vector<2x32xf32>
    %234 = arith.mulf %232, %233 : vector<2x32xf32>
    %c0_74 = arith.constant 0 : index
    %c0_75 = arith.constant 0 : index
    %235 = vector.load %arg8[%c0_74, %c0_75] : memref<2x64xf32, #tpu.memory_space<vmem>>, vector<2x32xf32>
    tpu.vector_store %arg8[%c0_74, %c0_75], %234 {strides = array<i32>} : memref<2x64xf32, #tpu.memory_space<vmem>>, vector<2x32xf32>,
    %c0_76 = arith.constant 0 : index
    %c0_77 = arith.constant 0 : index
    %236 = vector.load %arg8[%c0_76, %c0_77] : memref<2x64xf32, #tpu.memory_space<vmem>>, vector<2x64xf32>
    %cst_78 = arith.constant dense<0.000000e+00> : vector<2x256xf32>
    %237 = tpu.matmul %236, %6, %cst_78 {dimension_numbers = #tpu.dot_dimension_numbers<[1], [0], [0], [1], [0, 0, 1, 1], [], []>} : vector<2x64xf32>, vector<64x256xf32>, vector<2x256xf32> -> vector<2x256xf32>
    %238 = vector.extract_strided_slice %5 {offsets = [14, 0], sizes = [2, 256], strides = [1, 1]} : vector<16x256xf32> to vector<2x256xf32>
    %239 = arith.addf %237, %238 : vector<2x256xf32>
    %240 = vector.extract_strided_slice %239 {offsets = [0, 0], sizes = [2, 192], strides = [1, 1]} : vector<2x256xf32> to vector<2x192xf32>
    %cst_79 = arith.constant 5.000000e-01 : f32
    %241 = vector.broadcast %cst_79 : f32 to vector<2x192xf32>
    %242 = arith.mulf %241, %240 : vector<2x192xf32>
    %243 = math.tanh %242 : vector<2x192xf32>
    %cst_80 = arith.constant 5.000000e-01 : f32
    %244 = vector.broadcast %cst_80 : f32 to vector<2x192xf32>
    %245 = arith.mulf %244, %243 : vector<2x192xf32>
    %cst_81 = arith.constant 5.000000e-01 : f32
    %246 = vector.broadcast %cst_81 : f32 to vector<2x192xf32>
    %247 = arith.addf %245, %246 : vector<2x192xf32>
    %248 = vector.extract_strided_slice %239 {offsets = [0, 192], sizes = [2, 64], strides = [1, 1]} : vector<2x256xf32> to vector<2x64xf32>
    %249 = math.tanh %248 : vector<2x64xf32>
    %250 = vector.extract_strided_slice %247 {offsets = [0, 128], sizes = [2, 32], strides = [1, 1]} : vector<2x192xf32> to vector<2x32xf32>
    %251 = arith.mulf %250, %221 : vector<2x32xf32>
    %252 = vector.extract_strided_slice %247 {offsets = [0, 96], sizes = [2, 32], strides = [1, 1]} : vector<2x192xf32> to vector<2x32xf32>
    %253 = vector.extract_strided_slice %249 {offsets = [0, 32], sizes = [2, 32], strides = [1, 1]} : vector<2x64xf32> to vector<2x32xf32>
    %254 = arith.mulf %252, %253 : vector<2x32xf32>
    %255 = arith.addf %251, %254 : vector<2x32xf32>
    %256 = vector.extract_strided_slice %247 {offsets = [0, 160], sizes = [2, 32], strides = [1, 1]} : vector<2x192xf32> to vector<2x32xf32>
    %257 = math.tanh %255 : vector<2x32xf32>
    %258 = arith.mulf %256, %257 : vector<2x32xf32>
    %c0_82 = arith.constant 0 : index
    %c32_83 = arith.constant 32 : index
    %259 = vector.load %arg8[%c0_82, %c32_83] : memref<2x64xf32, #tpu.memory_space<vmem>>, vector<2x32xf32>
    tpu.vector_store %arg8[%c0_82, %c32_83], %258 {strides = array<i32>} : memref<2x64xf32, #tpu.memory_space<vmem>>, vector<2x32xf32>,
    %260 = vector.extract_strided_slice %247 {offsets = [0, 32], sizes = [2, 32], strides = [1, 1]} : vector<2x192xf32> to vector<2x32xf32>
    %261 = arith.mulf %260, %231 : vector<2x32xf32>
    %262 = vector.extract_strided_slice %247 {offsets = [0, 0], sizes = [2, 32], strides = [1, 1]} : vector<2x192xf32> to vector<2x32xf32>
    %263 = vector.extract_strided_slice %249 {offsets = [0, 0], sizes = [2, 32], strides = [1, 1]} : vector<2x64xf32> to vector<2x32xf32>
    %264 = arith.mulf %262, %263 : vector<2x32xf32>
    %265 = arith.addf %261, %264 : vector<2x32xf32>
    %266 = vector.extract_strided_slice %247 {offsets = [0, 64], sizes = [2, 32], strides = [1, 1]} : vector<2x192xf32> to vector<2x32xf32>
    %267 = math.tanh %265 : vector<2x32xf32>
    %268 = arith.mulf %266, %267 : vector<2x32xf32>
    %c0_84 = arith.constant 0 : index
    %c0_85 = arith.constant 0 : index
    %269 = vector.load %arg8[%c0_84, %c0_85] : memref<2x64xf32, #tpu.memory_space<vmem>>, vector<2x32xf32>
    tpu.vector_store %arg8[%c0_84, %c0_85], %268 {strides = array<i32>} : memref<2x64xf32, #tpu.memory_space<vmem>>, vector<2x32xf32>,
    %c0_86 = arith.constant 0 : index
    %c0_87 = arith.constant 0 : index
    %270 = vector.load %arg8[%c0_86, %c0_87] : memref<2x64xf32, #tpu.memory_space<vmem>>, vector<2x64xf32>
    %cst_88 = arith.constant dense<0.000000e+00> : vector<2x256xf32>
    %271 = tpu.matmul %270, %6, %cst_88 {dimension_numbers = #tpu.dot_dimension_numbers<[1], [0], [0], [1], [0, 0, 1, 1], [], []>} : vector<2x64xf32>, vector<64x256xf32>, vector<2x256xf32> -> vector<2x256xf32>
    %272 = vector.extract_strided_slice %5 {offsets = [14, 0], sizes = [2, 256], strides = [1, 1]} : vector<16x256xf32> to vector<2x256xf32>
    %273 = arith.addf %271, %272 : vector<2x256xf32>
    %274 = vector.extract_strided_slice %273 {offsets = [0, 0], sizes = [2, 192], strides = [1, 1]} : vector<2x256xf32> to vector<2x192xf32>
    %cst_89 = arith.constant 5.000000e-01 : f32
    %275 = vector.broadcast %cst_89 : f32 to vector<2x192xf32>
    %276 = arith.mulf %275, %274 : vector<2x192xf32>
    %277 = math.tanh %276 : vector<2x192xf32>
    %cst_90 = arith.constant 5.000000e-01 : f32
    %278 = vector.broadcast %cst_90 : f32 to vector<2x192xf32>
    %279 = arith.mulf %278, %277 : vector<2x192xf32>
    %cst_91 = arith.constant 5.000000e-01 : f32
    %280 = vector.broadcast %cst_91 : f32 to vector<2x192xf32>
    %281 = arith.addf %279, %280 : vector<2x192xf32>
    %282 = vector.extract_strided_slice %273 {offsets = [0, 192], sizes = [2, 64], strides = [1, 1]} : vector<2x256xf32> to vector<2x64xf32>
    %283 = math.tanh %282 : vector<2x64xf32>
    %284 = vector.extract_strided_slice %281 {offsets = [0, 128], sizes = [2, 32], strides = [1, 1]} : vector<2x192xf32> to vector<2x32xf32>
    %285 = arith.mulf %284, %255 : vector<2x32xf32>
    %286 = vector.extract_strided_slice %281 {offsets = [0, 96], sizes = [2, 32], strides = [1, 1]} : vector<2x192xf32> to vector<2x32xf32>
    %287 = vector.extract_strided_slice %283 {offsets = [0, 32], sizes = [2, 32], strides = [1, 1]} : vector<2x64xf32> to vector<2x32xf32>
    %288 = arith.mulf %286, %287 : vector<2x32xf32>
    %289 = arith.addf %285, %288 : vector<2x32xf32>
    %290 = vector.extract_strided_slice %281 {offsets = [0, 160], sizes = [2, 32], strides = [1, 1]} : vector<2x192xf32> to vector<2x32xf32>
    %291 = math.tanh %289 : vector<2x32xf32>
    %292 = arith.mulf %290, %291 : vector<2x32xf32>
    %c0_92 = arith.constant 0 : index
    %c0_93 = arith.constant 0 : index
    %293 = vector.load %arg5[%c0_92, %c0_93] : memref<1x32xf32, #tpu.memory_space<vmem>>, vector<1x32xf32>
    %294 = vector.broadcast %293 : vector<1x32xf32> to vector<2x32xf32>
    %295 = arith.mulf %292, %294 : vector<2x32xf32>
    %cst_94 = arith.constant dense<0.000000e+00> : vector<2xf32>
    %296 = vector.multi_reduction <add>, %295, %cst_94 [1] : vector<2x32xf32> to vector<2xf32>
    %297 = vector.shape_cast %296 : vector<2xf32> to vector<2x1xf32>
    %c0_95 = arith.constant 0 : index
    %c0_96 = arith.constant 0 : index
    %298 = vector.load %arg6[%c0_95, %c0_96] : memref<1x1xf32, #tpu.memory_space<vmem>>, vector<1x1xf32>
    %299 = vector.broadcast %298 : vector<1x1xf32> to vector<2x1xf32>
    %300 = arith.addf %297, %299 : vector<2x1xf32>
    %c0_97 = arith.constant 0 : index
    %c0_98 = arith.constant 0 : index
    %301 = vector.load %arg7[%c0_97, %c0_98] : memref<2x1xf32, #tpu.memory_space<vmem>>, vector<2x1xf32>
    tpu.vector_store %arg7[%c0_97, %c0_98], %300 {strides = array<i32>} : memref<2x1xf32, #tpu.memory_space<vmem>>, vector<2x1xf32>,
    return
  }
  func.func @transform_0(%arg0: i32) -> (i32, i32) {
    %c0_i32 = arith.constant 0 : i32
    %c0_i32_0 = arith.constant 0 : i32
    %c0_i32_1 = arith.constant 0 : i32
    return %c0_i32, %c0_i32_0 : i32, i32
  }
  func.func @transform_1(%arg0: i32) -> (i32, i32) {
    %c0_i32 = arith.constant 0 : i32
    %c0_i32_0 = arith.constant 0 : i32
    %c0_i32_1 = arith.constant 0 : i32
    return %c0_i32, %c0_i32_0 : i32, i32
  }
  func.func @transform_2(%arg0: i32) -> (i32, i32) {
    %c0_i32 = arith.constant 0 : i32
    %c0_i32_0 = arith.constant 0 : i32
    %c0_i32_1 = arith.constant 0 : i32
    return %c0_i32, %c0_i32_0 : i32, i32
  }
  func.func @transform_3(%arg0: i32) -> (i32, i32) {
    %c0_i32 = arith.constant 0 : i32
    %c0_i32_0 = arith.constant 0 : i32
    %c0_i32_1 = arith.constant 0 : i32
    return %c0_i32, %c0_i32_0 : i32, i32
  }
  func.func @transform_4(%arg0: i32) -> (i32, i32) {
    %c0_i32 = arith.constant 0 : i32
    %c0_i32_0 = arith.constant 0 : i32
    %c0_i32_1 = arith.constant 0 : i32
    return %c0_i32, %c0_i32_0 : i32, i32
  }
  func.func @transform_5(%arg0: i32) -> (i32, i32) {
    %c0_i32 = arith.constant 0 : i32
    %c0_i32_0 = arith.constant 0 : i32
    %c0_i32_1 = arith.constant 0 : i32
    return %c0_i32, %c0_i32_0 : i32, i32
  }
  func.func @transform_6(%arg0: i32) -> (i32, i32) {
    %c0_i32 = arith.constant 0 : i32
    %c0_i32_0 = arith.constant 0 : i32
    %c0_i32_1 = arith.constant 0 : i32
    return %c0_i32, %c0_i32_0 : i32, i32
  }
}

</mosaic_0001>

<bundles_post_ra>
// kernel: lstm_forward_pallas.1
= control target key start
LH: loop header
LB: loop body
LE: loop exit
PB: predicated region body
PF: predicated region fallthrough
CT: control target
= control target key end

     0   :  { %s1685_s0 = inlined_call_operand.vmem [shape: f32[16,4], index: 0, kind: input, shape index: {}]   ;;  %s1686_s1 = inlined_call_operand.vmem [shape: f32[4,256], index: 1, kind: input, shape index: {}]   ;;  %s1687_s2 = inlined_call_operand.hbm [shape: f32[64,256], index: 2, kind: input, shape index: {}]   ;;  %s1688_s3 = inlined_call_operand.vmem [shape: f32[1,256], index: 3, kind: input, shape index: {}]   ;;  %s1689_s4 = inlined_call_operand.vmem [shape: f32[1,32], index: 4, kind: input, shape index: {}]   ;;  %s1690_s5 = inlined_call_operand.<no memory space> [shape: f32[1,1], index: 5, kind: input, shape index: {}]   ;;  %s1691_s6 = inlined_call_operand.vmem [shape: f32[2,1], index: 6, kind: output, shape index: {}]  }
   0x1   :  { %v11_v0 = vstv %s1690_s5 }
   0x2   :  { %12 = vst [vmem:[#allocation3] sm:$0x1] %v11_v0 }
   0x3   :  { %13 = vsyncpa [#allocation5], 0  ;;  %s1318_s23 = smov [#allocation4]  }
   0x4   :  { %s23_s24 = sshll.u32 %s1318_s23, 4  ;;  %s24_s24 = int_to_ptr.vmem [resolvable:$true] %s23_s24 }
   0x5   :  { %s1304_s25 = scalar_lea.vmem %s24_s24, 2048  ;;  %p1309_p1 = scmp.lt.s32.totalorder %s24_s24, %s24_s24 }
   0x6   :  { %p1305_p0 = scmp.ne.s32.totalorder %s24_s24, %s1304_s25  ;;  %p1310_p2 = scmp.lt.s32.totalorder %s1304_s25, %s1304_s25 }
   0x8   :  { %p1311_p3 = por %p1310_p2, %p1309_p1 }
   0xa   :  { %p1312_p4 = pnand %p1311_p3, %p1305_p0 }
   0xc   :  { %1315 = shalt.err (!%p1312_p4)
}
   0xd   :  { %s1319_s26 = smov 256   ;;  %s1320_s27 = smov 16  }
   0xe   :  { %29 = dma.hbm_to_vmem [thread:$0]  %s1687_s2, 2048, %s24_s24, [#allocation5], %s1319_s26, %s1319_s26, %s1320_s27  }
   0xf   :  { %1316 = dma.done.wait [#allocation5], 2048  }
  0x10   :  { %1317 = vsyncadd [#allocation5], 4294965248  ;;  %v1321_v1 = vmov 0.0   ;;  %v41_v2 = vld [vmem:[%s1686_s1] sm:$0xff]  ;;  %vm63_vm0 = vcmask 1043456   ;;  %vm56_vm1 = vcmask 31744   ;;  %v44_v5 = vlaneseq }
  0x11   :  { %132 = vmatprep.mubr.f32.mxu0 %v1321_v1  ;;  %266 = vmatprep.mubr.f32.mxu1 %v1321_v1  ;;  %v55_v3 = vcombine.high %v41_v2, %v41_v2  ;;  %v39_v4 = vld [vmem:[%s1685_s0] sm:$0xff]  ;;  %s1322_s1 = smov 64   ;;  %v1402_v27 = vld [vmem:[#allocation4 + $0x70] sm:$0xff]  ;;  %v1404_v28 = vld [vmem:[#allocation4 + $0x68] sm:$0xff]  ;;  %vm161_vm2 = vcmask 517120   ;;  %vm189_vm3 = vcmask 254976  }
  0x12   :  { %v45_v6 = vshrl.u32 %v44_v5, 7  ;;  %v42_v8 = vld [vmem:[%s1688_s3] sm:$0x3]  ;;  %s1323_s3 = smov 32   ;;  %v1407_v29 = vld [vmem:[#allocation4 + $0x60] sm:$0xff]  ;;  %v1416_v31 = vld [vmem:[#allocation4 + $0x50] sm:$0xff] }
  0x13   :  { %1190 = vmatprep.subr.msk.mxu0 %vm63_vm0, %v55_v3  ;;  %v1400_v26 = vld [vmem:[#allocation4 + $0x78] sm:$0xff]  ;;  %162 = vst.msk [vmem:[#allocation2] sm:$0x3] %vm161_vm2, %v1321_v1  ;;  %v1420_v32 = vld [vmem:[#allocation4 + $0x48] sm:$0xff]  ;;  %v1424_v33 = vld [vmem:[#allocation4 + $0x40] sm:$0xff]  ;;  %vm198_vm4 = vcmask 523264  }
  0x14   :  { %1191 = vmatpush1.msk.msra.mxu0 %vm63_vm0, %v41_v2  ;;  %v50_v7 = vsub.s32 1, %v45_v6  ;;  %v46_v14 = vsub.s32 0, %v45_v6  ;;  %218 = vmatprep.subr.mxu1 %v1400_v26  ;;  %v1412_v30 = vld [vmem:[#allocation4 + $0x58] sm:$0xff]  ;;  %v1437_v36 = vld [vmem:[#allocation4 + $0x30] sm:$0xff]  ;;  %v1441_v37 = vld [vmem:[#allocation4 + $0x28] sm:$0xff]  ;;  %vm295_vm5 = vcmask 517376  }
  0x15   :  { %1192 = vmatmul.mubr.msk.f32.vlgmr.msra.gmra.mxu0 %vm56_vm1, %v39_v4  ;;  %343 = vmatprep.subr.mxu0 %v1400_v26  ;;  %v1434_v35 = vld [vmem:[#allocation4 + $0x38] sm:$0xff]  ;;  %v1445_v38 = vld [vmem:[#allocation4 + $0x20] sm:$0xff]  ;;  %v1453_v40 = vld [vmem:[#allocation4 + $0x10] sm:$0xff]  ;;  %s1324_s13 = smov 96   ;;  %vm1183_vm6 = vcmask 1024  }
  0x16   :  { %138 = vmatprep.mubr.f32.mxu0 %v1321_v1  ;;  %v1379_v9 = vrot.slane %v42_v8, %v50_v7  ;;  %v1386_v15 = vrot.slane %v42_v8, %v46_v14  ;;  %219 = vmatpush1.msra.mxu1 %v1402_v27  ;;  %v1449_v39 = vld [vmem:[#allocation4 + $0x18] sm:$0xff]  ;;  %v1457_v41 = vld [vmem:[#allocation4 + $0x8] sm:$0xff]  ;;  %v1461_v42 = vld [vmem:[#allocation4] sm:$0xff] }
  0x17   :  { %344 = vmatpush1.msra.mxu0 %v1402_v27  ;;  %220 = vmatprep.subr.mxu1 %v1404_v28  ;;  %v40_v14 = vld [vmem:[%s1685_s0 + $0x8] sm:$0xff] }
  0x18   :  { %345 = vmatprep.subr.mxu0 %v1404_v28  ;;  %221 = vmatpush1.msra.mxu1 %v1407_v29 }
  0x19   :  { %346 = vmatpush1.msra.mxu0 %v1407_v29  ;;  %222 = vmatprep.subr.mxu1 %v1412_v30 }
  0x1a   :  { %347 = vmatprep.subr.mxu0 %v1412_v30  ;;  %223 = vmatpush1.msra.mxu1 %v1416_v31 }
  0x1b   :  { %348 = vmatpush1.msra.mxu0 %v1416_v31  ;;  %224 = vmatprep.subr.mxu1 %v1420_v32 }
  0x1c   :  { %349 = vmatprep.subr.mxu0 %v1420_v32  ;;  %225 = vmatpush1.msra.mxu1 %v1424_v33 }
  0x1d   :  { %350 = vmatpush1.msra.mxu0 %v1424_v33  ;;  %226 = vmatprep.subr.mxu1 %v1434_v35 }
  0x1e   :  { %351 = vmatprep.subr.mxu0 %v1434_v35  ;;  %227 = vmatpush1.msra.mxu1 %v1437_v36 }
  0x1f   :  { %352 = vmatpush1.msra.mxu0 %v1437_v36  ;;  %228 = vmatprep.subr.mxu1 %v1441_v37 }
  0x20   :  { %353 = vmatprep.subr.mxu0 %v1441_v37  ;;  %229 = vmatpush1.msra.mxu1 %v1445_v38 }
  0x21   :  { %354 = vmatpush1.msra.mxu0 %v1445_v38  ;;  %230 = vmatprep.subr.mxu1 %v1449_v39 }
  0x22   :  { %355 = vmatprep.subr.mxu0 %v1449_v39  ;;  %231 = vmatpush1.msra.mxu1 %v1453_v40 }
  0x23   :  { %356 = vmatpush1.msra.mxu0 %v1453_v40  ;;  %232 = vmatprep.subr.mxu1 %v1457_v41 }
  0x24   :  { %357 = vmatprep.subr.mxu0 %v1457_v41  ;;  %233 = vmatpush1.msra.mxu1 %v1461_v42 }
  0x25   :  { %358 = vmatpush1.msra.mxu0 %v1461_v42  ;;  %467 = vmatprep.subr.mxu1 %v1400_v26 }
  0x26   :  { %587 = vmatprep.subr.mxu0 %v1400_v26  ;;  %1193 = vmatmul.mubr.msk.f32.gmra.mxu0 %vm56_vm1, %v40_v14 }
  0x27   :  { %391 = vmatprep.mubr.f32.mxu0 %v1321_v1 }
  0xd5   :  { %v134_v10 = vpop.f32.mrf.mxu0 }
  0xd6   :  { %v1389_v16 = vadd.f32 %v134_v10, %v1386_v15 }
  0xd7   :  { %v136_v11 = vpop.f32.mrf.mxu0 }
  0xd8   :  { %v1382_v12 = vadd.f32 %v136_v11, %v1379_v9  ;;  %v163_v17 = vmul.f32 0.5, %v1389_v16  ;;  %v194_v47 = vrot.slane %v1389_v16, 2 }
  0xda   :  { %1212 = vtanh.f32 %v1382_v12  ;;  %v195_v50 = vrot.slane %v1382_v12, 2 }
  0xdb   :  { %1214 = vtanh.f32 %v163_v17 }
  0xe7   :  { %v1213_v13 = vpop.eup %1212 }
  0xe8   :  { %170 = vrot.lane.b32.xlu0 %v1213_v13, %s1322_s1  ;;  %v1215_v18 = vpop.eup %1214 }
  0xe9   :  { %v165_v19 = vmul.f32 0.5, %v1215_v18 }
  0xeb   :  { %v1392_v20 = vadd.f32 0.5, %v165_v19 }
  0xed   :  { %v168_v23 = vmul.f32 0.0, %v1392_v20 }
 0x15a   :  { %v171_v21 = vpop.permute.xlu0 %170 }
 0x15b   :  { %v173_v22 = vmul.f32 %v171_v21, %v1392_v20  ;;  %v1529_v21 = vpop.f32.mrf.mxu0 }
 0x15d   :  { %175 = vrot.lane.b32.xlu0 %v173_v22, %s1323_s3  ;;  %v1531_v22 = vpop.f32.mrf.mxu0 }
 0x1cf   :  { %v176_v24 = vpop.permute.xlu0 %175 }
 0x1d0   :  { %v1397_v25 = vadd.f32 %v176_v24, %v168_v23  ;;  %v320_v23 = vrot.slane %v1389_v16, 4 }
 0x1d2   :  { %1216 = vtanh.f32 %v1397_v25 }
 0x1df   :  { %v1217_v34 = vpop.eup %1216 }
 0x1e0   :  { %181 = vrot.lane.b32.xlu1 %v1217_v34, %s1323_s3  ;;  %v321_v34 = vrot.slane %v1382_v12, 4 }
 0x252   :  { %v182_v43 = vpop.permute.xlu1 %181 }
 0x253   :  { %v184_v44 = vmul.f32 %v182_v43, %v1392_v20 }
 0x255   :  { %186 = vrot.lane.b32.xlu1 %v184_v44, %s1322_s1 }
 0x2c7   :  { %v187_v45 = vpop.permute.xlu1 %186 }
 0x2c8   :  { %190 = vst.msk [vmem:[#allocation2] sm:$0x3] %vm189_vm3, %v187_v45 }
 0x2cf   :  { %v191_v46 = vld [vmem:[#allocation2] sm:$0x3] }
 0x2d0   :  { %1194 = vmatmul.mubr.msk.f32.vlgmr.msra.gmra.mxu1 %vm198_vm4, %v191_v46 }
 0x2d1   :  { %468 = vmatpush1.msra.mxu1 %v1402_v27  ;;  %515 = vmatprep.mubr.f32.mxu1 %v1321_v1 }
 0x2d2   :  { %469 = vmatprep.subr.mxu1 %v1404_v28 }
 0x2d3   :  { %470 = vmatpush1.msra.mxu1 %v1407_v29 }
 0x2d4   :  { %471 = vmatprep.subr.mxu1 %v1412_v30 }
 0x2d5   :  { %472 = vmatpush1.msra.mxu1 %v1416_v31 }
 0x2d6   :  { %473 = vmatprep.subr.mxu1 %v1420_v32 }
 0x2d7   :  { %474 = vmatpush1.msra.mxu1 %v1424_v33 }
 0x2d8   :  { %475 = vmatprep.subr.mxu1 %v1434_v35 }
 0x2d9   :  { %476 = vmatpush1.msra.mxu1 %v1437_v36 }
 0x2da   :  { %477 = vmatprep.subr.mxu1 %v1441_v37 }
 0x2db   :  { %478 = vmatpush1.msra.mxu1 %v1445_v38 }
 0x2dc   :  { %479 = vmatprep.subr.mxu1 %v1449_v39 }
 0x2dd   :  { %480 = vmatpush1.msra.mxu1 %v1453_v40 }
 0x2de   :  { %481 = vmatprep.subr.mxu1 %v1457_v41 }
 0x2df   :  { %482 = vmatpush1.msra.mxu1 %v1461_v42 }
 0x2e0   :  { %713 = vmatprep.subr.mxu1 %v1400_v26 }
 0x390   :  { %v268_v48 = vpop.f32.mrf.mxu1 }
 0x391   :  { %v269_v49 = vadd.f32 %v268_v48, %v194_v47 }
 0x392   :  { %v270_v51 = vpop.f32.mrf.mxu1 }
 0x393   :  { %v273_v52 = vmul.f32 0.5, %v269_v49  ;;  %v271_v53 = vadd.f32 %v270_v51, %v195_v50 }
 0x395   :  { %1218 = vtanh.f32 %v273_v52  ;;  %v274_v59 = vmul.f32 0.5, %v271_v53 }
 0x396   :  { %1220 = vtanh.f32 %v271_v53 }
 0x397   :  { %1222 = vtanh.f32 %v274_v59 }
 0x3a2   :  { %v1219_v54 = vpop.eup %1218 }
 0x3a3   :  { %v1221_v55 = vpop.eup %1220  ;;  %v277_v56 = vmul.f32 0.5, %v1219_v54 }
 0x3a4   :  { %299 = vrot.lane.b32.xlu0 %v1221_v55, %s1322_s1  ;;  %v1223_v60 = vpop.eup %1222 }
 0x3a5   :  { %v279_v57 = vadd.f32 0.5, %v277_v56  ;;  %v278_v61 = vmul.f32 0.5, %v1223_v60 }
 0x3a7   :  { %v283_v58 = vmul.f32 %v1221_v55, %v279_v57  ;;  %v280_v63 = vadd.f32 0.5, %v278_v61  ;;  %v297_v6 = vmul.f32 %v279_v57, %v1397_v25 }
 0x3a9   :  { %285 = vrot.lane.b32.xlu0 %v283_v58, %s1323_s3  ;;  %v282_v2 = vmul.f32 0.0, %v280_v63 }
 0x416   :  { %v300_v62 = vpop.permute.xlu0 %299 }
 0x417   :  { %v302_v0 = vmul.f32 %v300_v62, %v279_v57 }
 0x419   :  { %304 = vrot.lane.b32.xlu1 %v302_v0, %s1323_s3 }
 0x41b   :  { %v286_v3 = vpop.permute.xlu0 %285 }
 0x41c   :  { %v1494_v4 = vadd.f32 %v286_v3, %v282_v2 }
 0x41e   :  { %1224 = vtanh.f32 %v1494_v4 }
 0x42b   :  { %v1225_v5 = vpop.eup %1224 }
 0x42c   :  { %291 = vrot.lane.b32.xlu0 %v1225_v5, %s1323_s3 }
 0x48b   :  { %v305_v7 = vpop.permute.xlu1 %304 }
 0x48c   :  { %v1499_v8 = vadd.f32 %v305_v7, %v297_v6 }
 0x48e   :  { %1226 = vtanh.f32 %v1499_v8 }
 0x49b   :  { %v1227_v10 = vpop.eup %1226 }
 0x49c   :  { %310 = vrot.lane.b32.xlu1 %v1227_v10, %s1323_s3 }
 0x49e   :  { %v292_v11 = vpop.permute.xlu0 %291 }
 0x49f   :  { %v294_v13 = vmul.f32 %v292_v11, %v280_v63 }
 0x4a1   :  { %296 = vst.msk [vmem:[#allocation2] sm:$0x3] %vm295_vm5, %v294_v13  ;;  %v445_v13 = vrot.slane %v1382_v12, 6 }
 0x50e   :  { %v311_v17 = vpop.permute.xlu1 %310 }
 0x50f   :  { %v313_v18 = vmul.f32 %v311_v17, %v279_v57 }
 0x511   :  { %315 = vrot.lane.b32.xlu1 %v313_v18, %s1322_s1 }
 0x583   :  { %v316_v19 = vpop.permute.xlu1 %315 }
 0x584   :  { %318 = vst.msk [vmem:[#allocation2] sm:$0x3] %vm189_vm3, %v316_v19 }
 0x58b   :  { %v319_v20 = vld [vmem:[#allocation2] sm:$0x3] }
 0x58c   :  { %1195 = vmatmul.mubr.msk.f32.vlgmr.msra.gmra.mxu0 %vm198_vm4, %v319_v20 }
 0x58d   :  { %588 = vmatpush1.msra.mxu0 %v1402_v27  ;;  %635 = vmatprep.mubr.f32.mxu0 %v1321_v1 }
 0x58e   :  { %589 = vmatprep.subr.mxu0 %v1404_v28 }
 0x58f   :  { %590 = vmatpush1.msra.mxu0 %v1407_v29 }
 0x590   :  { %591 = vmatprep.subr.mxu0 %v1412_v30 }
 0x591   :  { %592 = vmatpush1.msra.mxu0 %v1416_v31 }
 0x592   :  { %593 = vmatprep.subr.mxu0 %v1420_v32 }
 0x593   :  { %594 = vmatpush1.msra.mxu0 %v1424_v33 }
 0x594   :  { %595 = vmatprep.subr.mxu0 %v1434_v35 }
 0x595   :  { %596 = vmatpush1.msra.mxu0 %v1437_v36 }
 0x596   :  { %597 = vmatprep.subr.mxu0 %v1441_v37 }
 0x597   :  { %598 = vmatpush1.msra.mxu0 %v1445_v38 }
 0x598   :  { %599 = vmatprep.subr.mxu0 %v1449_v39 }
 0x599   :  { %600 = vmatpush1.msra.mxu0 %v1453_v40 }
 0x59a   :  { %601 = vmatprep.subr.mxu0 %v1457_v41 }
 0x59b   :  { %602 = vmatpush1.msra.mxu0 %v1461_v42 }
 0x59c   :  { %837 = vmatprep.subr.mxu0 %v1400_v26 }
 0x64c   :  { %v393_v24 = vpop.f32.mrf.mxu0 }
 0x64d   :  { %v394_v25 = vadd.f32 %v393_v24, %v320_v23 }
 0x64e   :  { %v395_v43 = vpop.f32.mrf.mxu0 }
 0x64f   :  { %v398_v44 = vmul.f32 0.5, %v394_v25  ;;  %v396_v45 = vadd.f32 %v395_v43, %v321_v34 }
 0x651   :  { %1228 = vtanh.f32 %v398_v44  ;;  %v399_v51 = vmul.f32 0.5, %v396_v45 }
 0x652   :  { %1230 = vtanh.f32 %v396_v45 }
 0x653   :  { %1232 = vtanh.f32 %v399_v51 }
 0x65e   :  { %v1229_v46 = vpop.eup %1228 }
 0x65f   :  { %v1231_v47 = vpop.eup %1230  ;;  %v402_v48 = vmul.f32 0.5, %v1229_v46 }
 0x660   :  { %423 = vrot.lane.b32.xlu0 %v1231_v47, %s1322_s1  ;;  %v1233_v52 = vpop.eup %1232 }
 0x661   :  { %v404_v49 = vadd.f32 0.5, %v402_v48  ;;  %v403_v53 = vmul.f32 0.5, %v1233_v52 }
 0x663   :  { %v408_v50 = vmul.f32 %v1231_v47, %v404_v49  ;;  %v405_v55 = vadd.f32 0.5, %v403_v53  ;;  %v421_v61 = vmul.f32 %v404_v49, %v1499_v8  ;;  %v444_v8 = vrot.slane %v1389_v16, 6 }
 0x665   :  { %410 = vrot.lane.b32.xlu0 %v408_v50, %s1323_s3  ;;  %v407_v57 = vmul.f32 %v405_v55, %v1494_v4 }
 0x6d2   :  { %v424_v54 = vpop.permute.xlu0 %423 }
 0x6d3   :  { %v426_v56 = vmul.f32 %v424_v54, %v404_v49 }
 0x6d5   :  { %428 = vrot.lane.b32.xlu1 %v426_v56, %s1323_s3 }
 0x6d7   :  { %v411_v58 = vpop.permute.xlu0 %410 }
 0x6d8   :  { %v413_v59 = vadd.f32 %v411_v58, %v407_v57 }
 0x6da   :  { %1234 = vtanh.f32 %v413_v59 }
 0x6e7   :  { %v1235_v60 = vpop.eup %1234 }
 0x6e8   :  { %416 = vrot.lane.b32.xlu0 %v1235_v60, %s1323_s3  ;;  %v1593_v60 = vadd.f32 %v1529_v21, %v1386_v15 }
 0x747   :  { %v429_v62 = vpop.permute.xlu1 %428 }
 0x748   :  { %v431_v63 = vadd.f32 %v429_v62, %v421_v61  ;;  %v1597_v62 = vadd.f32 %v1531_v22, %v1379_v9 }
 0x74a   :  { %1236 = vtanh.f32 %v431_v63 }
 0x757   :  { %v1237_v0 = vpop.eup %1236 }
 0x758   :  { %434 = vrot.lane.b32.xlu1 %v1237_v0, %s1323_s3 }
 0x75a   :  { %v417_v2 = vpop.permute.xlu0 %416 }
 0x75b   :  { %v419_v3 = vmul.f32 %v417_v2, %v405_v55 }
 0x75d   :  { %420 = vst.msk [vmem:[#allocation2] sm:$0x3] %vm295_vm5, %v419_v3 }
 0x7ca   :  { %v435_v5 = vpop.permute.xlu1 %434 }
 0x7cb   :  { %v437_v4 = vmul.f32 %v435_v5, %v404_v49 }
 0x7cd   :  { %439 = vrot.lane.b32.xlu1 %v437_v4, %s1322_s1 }
 0x83f   :  { %v440_v6 = vpop.permute.xlu1 %439 }
 0x840   :  { %442 = vst.msk [vmem:[#allocation2] sm:$0x3] %vm189_vm3, %v440_v6 }
 0x847   :  { %v443_v7 = vld [vmem:[#allocation2] sm:$0x3] }
 0x848   :  { %1196 = vmatmul.mubr.msk.f32.vlgmr.msra.gmra.mxu1 %vm198_vm4, %v443_v7 }
 0x849   :  { %714 = vmatpush1.msra.mxu1 %v1402_v27  ;;  %761 = vmatprep.mubr.f32.mxu1 %v1321_v1 }
 0x84a   :  { %715 = vmatprep.subr.mxu1 %v1404_v28 }
 0x84b   :  { %716 = vmatpush1.msra.mxu1 %v1407_v29 }
 0x84c   :  { %717 = vmatprep.subr.mxu1 %v1412_v30 }
 0x84d   :  { %718 = vmatpush1.msra.mxu1 %v1416_v31 }
 0x84e   :  { %719 = vmatprep.subr.mxu1 %v1420_v32 }
 0x84f   :  { %720 = vmatpush1.msra.mxu1 %v1424_v33 }
 0x850   :  { %721 = vmatprep.subr.mxu1 %v1434_v35 }
 0x851   :  { %722 = vmatpush1.msra.mxu1 %v1437_v36 }
 0x852   :  { %723 = vmatprep.subr.mxu1 %v1441_v37 }
 0x853   :  { %724 = vmatpush1.msra.mxu1 %v1445_v38 }
 0x854   :  { %725 = vmatprep.subr.mxu1 %v1449_v39 }
 0x855   :  { %726 = vmatpush1.msra.mxu1 %v1453_v40 }
 0x856   :  { %727 = vmatprep.subr.mxu1 %v1457_v41 }
 0x857   :  { %728 = vmatpush1.msra.mxu1 %v1461_v42 }
 0x858   :  { %961 = vmatprep.subr.mxu1 %v1400_v26 }
 0x908   :  { %v517_v10 = vpop.f32.mrf.mxu1 }
 0x909   :  { %v518_v11 = vadd.f32 %v517_v10, %v444_v8 }
 0x90a   :  { %v519_v14 = vpop.f32.mrf.mxu1 }
 0x90b   :  { %v522_v17 = vmul.f32 0.5, %v518_v11  ;;  %v520_v18 = vadd.f32 %v519_v14, %v445_v13 }
 0x90d   :  { %1238 = vtanh.f32 %v522_v17  ;;  %v523_v34 = vmul.f32 0.5, %v520_v18 }
 0x90e   :  { %1240 = vtanh.f32 %v520_v18 }
 0x90f   :  { %1242 = vtanh.f32 %v523_v34 }
 0x91a   :  { %v1239_v19 = vpop.eup %1238 }
 0x91b   :  { %v1241_v20 = vpop.eup %1240  ;;  %v526_v23 = vmul.f32 0.5, %v1239_v19 }
 0x91c   :  { %547 = vrot.lane.b32.xlu0 %v1241_v20, %s1322_s1  ;;  %v1243_v16 = vpop.eup %1242 }
 0x91d   :  { %v528_v24 = vadd.f32 0.5, %v526_v23  ;;  %v527_v43 = vmul.f32 0.5, %v1243_v16 }
 0x91f   :  { %v532_v25 = vmul.f32 %v1241_v20, %v528_v24  ;;  %v529_v12 = vadd.f32 0.5, %v527_v43  ;;  %v545_v50 = vmul.f32 %v528_v24, %v431_v63 }
 0x921   :  { %534 = vrot.lane.b32.xlu0 %v532_v25, %s1323_s3  ;;  %v531_v46 = vmul.f32 %v529_v12, %v413_v59 }
 0x98e   :  { %v548_v44 = vpop.permute.xlu0 %547 }
 0x98f   :  { %v550_v45 = vmul.f32 %v548_v44, %v528_v24 }
 0x991   :  { %552 = vrot.lane.b32.xlu1 %v550_v45, %s1323_s3 }
 0x993   :  { %v535_v47 = vpop.permute.xlu0 %534 }
 0x994   :  { %v537_v48 = vadd.f32 %v535_v47, %v531_v46  ;;  %v691_v47 = vrot.slane %v1597_v62, 2 }
 0x996   :  { %1244 = vtanh.f32 %v537_v48 }
 0x9a3   :  { %v1245_v49 = vpop.eup %1244 }
 0x9a4   :  { %540 = vrot.lane.b32.xlu0 %v1245_v49, %s1323_s3 }
 0xa03   :  { %v553_v51 = vpop.permute.xlu1 %552 }
 0xa04   :  { %v555_v52 = vadd.f32 %v553_v51, %v545_v50 }
 0xa06   :  { %1246 = vtanh.f32 %v555_v52 }
 0xa13   :  { %v1247_v53 = vpop.eup %1246 }
 0xa14   :  { %558 = vrot.lane.b32.xlu1 %v1247_v53, %s1323_s3 }
 0xa16   :  { %v541_v54 = vpop.permute.xlu0 %540 }
 0xa17   :  { %v543_v55 = vmul.f32 %v541_v54, %v529_v12  ;;  %v690_v12 = vrot.slane %v1593_v60, 2 }
 0xa19   :  { %544 = vst.msk [vmem:[#allocation2] sm:$0x3] %vm295_vm5, %v543_v55 }
 0xa86   :  { %v559_v56 = vpop.permute.xlu1 %558 }
 0xa87   :  { %v561_v57 = vmul.f32 %v559_v56, %v528_v24 }
 0xa89   :  { %563 = vrot.lane.b32.xlu1 %v561_v57, %s1322_s1 }
 0xafb   :  { %v564_v58 = vpop.permute.xlu1 %563 }
 0xafc   :  { %566 = vst.msk [vmem:[#allocation2] sm:$0x3] %vm189_vm3, %v564_v58 }
 0xb03   :  { %v567_v59 = vld [vmem:[#allocation2] sm:$0x3] }
 0xb04   :  { %1197 = vmatmul.mubr.msk.f32.vlgmr.msra.gmra.mxu0 %vm198_vm4, %v567_v59 }
 0xb05   :  { %838 = vmatpush1.msra.mxu0 %v1402_v27  ;;  %885 = vmatprep.mubr.f32.mxu0 %v1321_v1 }
 0xb06   :  { %839 = vmatprep.subr.mxu0 %v1404_v28 }
 0xb07   :  { %840 = vmatpush1.msra.mxu0 %v1407_v29 }
 0xb08   :  { %841 = vmatprep.subr.mxu0 %v1412_v30 }
 0xb09   :  { %842 = vmatpush1.msra.mxu0 %v1416_v31 }
 0xb0a   :  { %843 = vmatprep.subr.mxu0 %v1420_v32 }
 0xb0b   :  { %844 = vmatpush1.msra.mxu0 %v1424_v33 }
 0xb0c   :  { %845 = vmatprep.subr.mxu0 %v1434_v35 }
 0xb0d   :  { %846 = vmatpush1.msra.mxu0 %v1437_v36 }
 0xb0e   :  { %847 = vmatprep.subr.mxu0 %v1441_v37 }
 0xb0f   :  { %848 = vmatpush1.msra.mxu0 %v1445_v38 }
 0xb10   :  { %849 = vmatprep.subr.mxu0 %v1449_v39 }
 0xb11   :  { %850 = vmatpush1.msra.mxu0 %v1453_v40 }
 0xb12   :  { %851 = vmatprep.subr.mxu0 %v1457_v41 }
 0xb13   :  { %852 = vmatpush1.msra.mxu0 %v1461_v42 }
 0xb14   :  { %1081 = vmatprep.subr.mxu0 %v1400_v26 }
 0xbc4   :  { %v637_v61 = vpop.f32.mrf.mxu0 }
 0xbc5   :  { %v638_v63 = vadd.f32 %v637_v61, %v1593_v60 }
 0xbc6   :  { %v639_v0 = vpop.f32.mrf.mxu0 }
 0xbc7   :  { %v642_v2 = vmul.f32 0.5, %v638_v63  ;;  %v640_v3 = vadd.f32 %v639_v0, %v1597_v62 }
 0xbc9   :  { %1248 = vtanh.f32 %v642_v2  ;;  %v643_v6 = vmul.f32 0.5, %v640_v3 }
 0xbca   :  { %1250 = vtanh.f32 %v640_v3 }
 0xbcb   :  { %1252 = vtanh.f32 %v643_v6 }
 0xbd6   :  { %v1249_v5 = vpop.eup %1248 }
 0xbd7   :  { %v1251_v4 = vpop.eup %1250  ;;  %v646_v26 = vmul.f32 0.5, %v1249_v5 }
 0xbd8   :  { %667 = vrot.lane.b32.xlu0 %v1251_v4, %s1322_s1  ;;  %v1253_v9 = vpop.eup %1252 }
 0xbd9   :  { %v648_v15 = vadd.f32 0.5, %v646_v26  ;;  %v647_v22 = vmul.f32 0.5, %v1253_v9 }
 0xbdb   :  { %v652_v21 = vmul.f32 %v1251_v4, %v648_v15  ;;  %v649_v8 = vadd.f32 0.5, %v647_v22  ;;  %v665_v18 = vmul.f32 %v648_v15, %v555_v52 }
 0xbdd   :  { %654 = vrot.lane.b32.xlu0 %v652_v21, %s1323_s3  ;;  %v651_v11 = vmul.f32 %v649_v8, %v537_v48 }
 0xc4a   :  { %v668_v7 = vpop.permute.xlu0 %667 }
 0xc4b   :  { %v670_v10 = vmul.f32 %v668_v7, %v648_v15 }
 0xc4d   :  { %672 = vrot.lane.b32.xlu1 %v670_v10, %s1323_s3 }
 0xc4f   :  { %v655_v13 = vpop.permute.xlu0 %654 }
 0xc50   :  { %v657_v14 = vadd.f32 %v655_v13, %v651_v11 }
 0xc52   :  { %1254 = vtanh.f32 %v657_v14 }
 0xc5f   :  { %v1255_v17 = vpop.eup %1254 }
 0xc60   :  { %660 = vrot.lane.b32.xlu0 %v1255_v17, %s1323_s3 }
 0xcbf   :  { %v673_v19 = vpop.permute.xlu1 %672 }
 0xcc0   :  { %v675_v20 = vadd.f32 %v673_v19, %v665_v18 }
 0xcc2   :  { %1256 = vtanh.f32 %v675_v20 }
 0xccf   :  { %v1257_v23 = vpop.eup %1256 }
 0xcd0   :  { %678 = vrot.lane.b32.xlu1 %v1257_v23, %s1323_s3 }
 0xcd2   :  { %v661_v24 = vpop.permute.xlu0 %660 }
 0xcd3   :  { %v663_v25 = vmul.f32 %v661_v24, %v649_v8 }
 0xcd5   :  { %664 = vst.msk [vmem:[#allocation2] sm:$0x3] %vm295_vm5, %v663_v25 }
 0xd42   :  { %v679_v34 = vpop.permute.xlu1 %678 }
 0xd43   :  { %v681_v16 = vmul.f32 %v679_v34, %v648_v15 }
 0xd45   :  { %683 = vrot.lane.b32.xlu1 %v681_v16, %s1322_s1 }
 0xdb7   :  { %v684_v43 = vpop.permute.xlu1 %683 }
 0xdb8   :  { %686 = vst.msk [vmem:[#allocation2] sm:$0x3] %vm189_vm3, %v684_v43 }
 0xdbf   :  { %v687_v44 = vld [vmem:[#allocation2] sm:$0x3] }
 0xdc0   :  { %1198 = vmatmul.mubr.msk.f32.vlgmr.msra.gmra.mxu1 %vm198_vm4, %v687_v44 }
 0xdc1   :  { %962 = vmatpush1.msra.mxu1 %v1402_v27  ;;  %1009 = vmatprep.mubr.f32.mxu1 %v1321_v1 }
 0xdc2   :  { %963 = vmatprep.subr.mxu1 %v1404_v28 }
 0xdc3   :  { %964 = vmatpush1.msra.mxu1 %v1407_v29 }
 0xdc4   :  { %965 = vmatprep.subr.mxu1 %v1412_v30 }
 0xdc5   :  { %966 = vmatpush1.msra.mxu1 %v1416_v31 }
 0xdc6   :  { %967 = vmatprep.subr.mxu1 %v1420_v32 }
 0xdc7   :  { %968 = vmatpush1.msra.mxu1 %v1424_v33 }
 0xdc8   :  { %969 = vmatprep.subr.mxu1 %v1434_v35 }
 0xdc9   :  { %970 = vmatpush1.msra.mxu1 %v1437_v36 }
 0xdca   :  { %971 = vmatprep.subr.mxu1 %v1441_v37 }
 0xdcb   :  { %972 = vmatpush1.msra.mxu1 %v1445_v38 }
 0xdcc   :  { %973 = vmatprep.subr.mxu1 %v1449_v39 }
 0xdcd   :  { %974 = vmatpush1.msra.mxu1 %v1453_v40 }
 0xdce   :  { %975 = vmatprep.subr.mxu1 %v1457_v41 }
 0xdcf   :  { %976 = vmatpush1.msra.mxu1 %v1461_v42 }
 0xe80   :  { %v763_v45 = vpop.f32.mrf.mxu1 }
 0xe81   :  { %v764_v46 = vadd.f32 %v763_v45, %v690_v12 }
 0xe82   :  { %v765_v48 = vpop.f32.mrf.mxu1 }
 0xe83   :  { %v768_v49 = vmul.f32 0.5, %v764_v46  ;;  %v766_v50 = vadd.f32 %v765_v48, %v691_v47  ;;  %v938_v46 = vrot.slane %v1593_v60, 6 }
 0xe85   :  { %1258 = vtanh.f32 %v768_v49  ;;  %v769_v56 = vmul.f32 0.5, %v766_v50  ;;  %v939_v49 = vrot.slane %v1597_v62, 6 }
 0xe86   :  { %1260 = vtanh.f32 %v766_v50 }
 0xe87   :  { %1262 = vtanh.f32 %v769_v56 }
 0xe92   :  { %v1259_v51 = vpop.eup %1258 }
 0xe93   :  { %v1261_v52 = vpop.eup %1260  ;;  %v772_v53 = vmul.f32 0.5, %v1259_v51 }
 0xe94   :  { %793 = vrot.lane.b32.xlu0 %v1261_v52, %s1322_s1  ;;  %v1263_v57 = vpop.eup %1262 }
 0xe95   :  { %v774_v54 = vadd.f32 0.5, %v772_v53  ;;  %v773_v58 = vmul.f32 0.5, %v1263_v57 }
 0xe97   :  { %v778_v55 = vmul.f32 %v1261_v52, %v774_v54  ;;  %v775_v61 = vadd.f32 0.5, %v773_v58  ;;  %v791_v4 = vmul.f32 %v774_v54, %v675_v20 }
 0xe99   :  { %780 = vrot.lane.b32.xlu0 %v778_v55, %s1323_s3  ;;  %v777_v0 = vmul.f32 %v775_v61, %v657_v14 }
 0xf06   :  { %v794_v59 = vpop.permute.xlu0 %793 }
 0xf07   :  { %v796_v63 = vmul.f32 %v794_v59, %v774_v54 }
 0xf09   :  { %798 = vrot.lane.b32.xlu1 %v796_v63, %s1323_s3 }
 0xf0b   :  { %v781_v2 = vpop.permute.xlu0 %780 }
 0xf0c   :  { %v783_v3 = vadd.f32 %v781_v2, %v777_v0 }
 0xf0e   :  { %1264 = vtanh.f32 %v783_v3 }
 0xf1b   :  { %v1265_v5 = vpop.eup %1264 }
 0xf1c   :  { %786 = vrot.lane.b32.xlu0 %v1265_v5, %s1323_s3 }
 0xf7b   :  { %v799_v26 = vpop.permute.xlu1 %798 }
 0xf7c   :  { %v801_v15 = vadd.f32 %v799_v26, %v791_v4 }
 0xf7e   :  { %1266 = vtanh.f32 %v801_v15 }
 0xf8b   :  { %v1267_v21 = vpop.eup %1266 }
 0xf8c   :  { %804 = vrot.lane.b32.xlu1 %v1267_v21, %s1323_s3 }
 0xf8e   :  { %v787_v6 = vpop.permute.xlu0 %786 }
 0xf8f   :  { %v789_v9 = vmul.f32 %v787_v6, %v775_v61 }
 0xf91   :  { %790 = vst.msk [vmem:[#allocation2] sm:$0x3] %vm295_vm5, %v789_v9 }
 0xffe   :  { %v805_v22 = vpop.permute.xlu1 %804 }
 0xfff   :  { %v807_v7 = vmul.f32 %v805_v22, %v774_v54 }
0x1001   :  { %809 = vrot.lane.b32.xlu1 %v807_v7, %s1322_s1 }
0x1073   :  { %v810_v8 = vpop.permute.xlu1 %809 }
0x1074   :  { %812 = vst.msk [vmem:[#allocation2] sm:$0x3] %vm189_vm3, %v810_v8 }
0x107b   :  { %v813_v10 = vld [vmem:[#allocation2] sm:$0x3] }
0x107c   :  { %1199 = vmatmul.mubr.msk.f32.vlgmr.msra.gmra.mxu0 %vm198_vm4, %v813_v10 }
0x107d   :  { %1082 = vmatpush1.msra.mxu0 %v1402_v27  ;;  %1129 = vmatprep.mubr.f32.mxu0 %v1321_v1  ;;  %v814_v1 = vrot.slane %v1593_v60, 4 }
0x107e   :  { %1083 = vmatprep.subr.mxu0 %v1404_v28 }
0x107f   :  { %1084 = vmatpush1.msra.mxu0 %v1407_v29  ;;  %v815_v29 = vrot.slane %v1597_v62, 4 }
0x1080   :  { %1085 = vmatprep.subr.mxu0 %v1412_v30 }
0x1081   :  { %1086 = vmatpush1.msra.mxu0 %v1416_v31 }
0x1082   :  { %1087 = vmatprep.subr.mxu0 %v1420_v32 }
0x1083   :  { %1088 = vmatpush1.msra.mxu0 %v1424_v33 }
0x1084   :  { %1089 = vmatprep.subr.mxu0 %v1434_v35 }
0x1085   :  { %1090 = vmatpush1.msra.mxu0 %v1437_v36 }
0x1086   :  { %1091 = vmatprep.subr.mxu0 %v1441_v37 }
0x1087   :  { %1092 = vmatpush1.msra.mxu0 %v1445_v38 }
0x1088   :  { %1093 = vmatprep.subr.mxu0 %v1449_v39 }
0x1089   :  { %1094 = vmatpush1.msra.mxu0 %v1453_v40 }
0x108a   :  { %1095 = vmatprep.subr.mxu0 %v1457_v41 }
0x108b   :  { %1096 = vmatpush1.msra.mxu0 %v1461_v42 }
0x113c   :  { %v887_v27 = vpop.f32.mrf.mxu0 }
0x113d   :  { %v888_v28 = vadd.f32 %v887_v27, %v814_v1 }
0x113e   :  { %v889_v30 = vpop.f32.mrf.mxu0 }
0x113f   :  { %v892_v31 = vmul.f32 0.5, %v888_v28  ;;  %v890_v32 = vadd.f32 %v889_v30, %v815_v29 }
0x1141   :  { %1268 = vtanh.f32 %v892_v31  ;;  %v893_v39 = vmul.f32 0.5, %v890_v32 }
0x1142   :  { %1270 = vtanh.f32 %v890_v32 }
0x1143   :  { %1272 = vtanh.f32 %v893_v39 }
0x114e   :  { %v1269_v33 = vpop.eup %1268 }
0x114f   :  { %v1271_v35 = vpop.eup %1270  ;;  %v896_v36 = vmul.f32 0.5, %v1269_v33 }
0x1150   :  { %917 = vrot.lane.b32.xlu0 %v1271_v35, %s1322_s1  ;;  %v1273_v40 = vpop.eup %1272 }
0x1151   :  { %v898_v37 = vadd.f32 0.5, %v896_v36  ;;  %v897_v41 = vmul.f32 0.5, %v1273_v40 }
0x1153   :  { %v902_v38 = vmul.f32 %v1271_v35, %v898_v37  ;;  %v899_v11 = vadd.f32 0.5, %v897_v41  ;;  %v915_v20 = vmul.f32 %v898_v37, %v801_v15 }
0x1155   :  { %904 = vrot.lane.b32.xlu0 %v902_v38, %s1323_s3  ;;  %v901_v14 = vmul.f32 %v899_v11, %v783_v3 }
0x11c2   :  { %v918_v42 = vpop.permute.xlu0 %917 }
0x11c3   :  { %v920_v13 = vmul.f32 %v918_v42, %v898_v37 }
0x11c5   :  { %922 = vrot.lane.b32.xlu1 %v920_v13, %s1323_s3 }
0x11c7   :  { %v905_v17 = vpop.permute.xlu0 %904 }
0x11c8   :  { %v907_v18 = vadd.f32 %v905_v17, %v901_v14 }
0x11ca   :  { %1274 = vtanh.f32 %v907_v18 }
0x11d7   :  { %v1275_v19 = vpop.eup %1274 }
0x11d8   :  { %910 = vrot.lane.b32.xlu0 %v1275_v19, %s1323_s3 }
0x1237   :  { %v923_v23 = vpop.permute.xlu1 %922 }
0x1238   :  { %v925_v24 = vadd.f32 %v923_v23, %v915_v20 }
0x123a   :  { %1276 = vtanh.f32 %v925_v24 }
0x1247   :  { %v1277_v25 = vpop.eup %1276 }
0x1248   :  { %928 = vrot.lane.b32.xlu1 %v1277_v25, %s1323_s3  ;;  %v1203_v25 = vld [vmem:[#allocation3] ss:$0 sm:$0xff] }
0x124a   :  { %v911_v34 = vpop.permute.xlu0 %910 }
0x124b   :  { %v913_v16 = vmul.f32 %v911_v34, %v899_v11 }
0x124d   :  { %914 = vst.msk [vmem:[#allocation2] sm:$0x3] %vm295_vm5, %v913_v16 }
0x12ba   :  { %v929_v43 = vpop.permute.xlu1 %928 }
0x12bb   :  { %v931_v44 = vmul.f32 %v929_v43, %v898_v37  ;;  %v1202_v37 = vld [vmem:[%s1689_s4] ss:$0 sm:$0xff] }
0x12bd   :  { %933 = vrot.lane.b32.xlu1 %v931_v44, %s1322_s1 }
0x132f   :  { %v934_v12 = vpop.permute.xlu1 %933 }
0x1330   :  { %936 = vst.msk [vmem:[#allocation2] sm:$0x3] %vm189_vm3, %v934_v12 }
0x1337   :  { %v937_v45 = vld [vmem:[#allocation2] sm:$0x3] }
0x1338   :  { %1200 = vmatmul.mubr.msk.f32.vlgmr.msra.gmra.mxu1 %vm198_vm4, %v937_v45 }
0x13f8   :  { %v1011_v47 = vpop.f32.mrf.mxu1 }
0x13f9   :  { %v1012_v48 = vadd.f32 %v1011_v47, %v938_v46 }
0x13fa   :  { %v1013_v50 = vpop.f32.mrf.mxu1 }
0x13fb   :  { %v1016_v51 = vmul.f32 0.5, %v1012_v48  ;;  %v1014_v52 = vadd.f32 %v1013_v50, %v939_v49 }
0x13fd   :  { %1278 = vtanh.f32 %v1016_v51  ;;  %v1017_v58 = vmul.f32 0.5, %v1014_v52 }
0x13fe   :  { %1280 = vtanh.f32 %v1014_v52 }
0x13ff   :  { %1282 = vtanh.f32 %v1017_v58 }
0x140a   :  { %v1279_v53 = vpop.eup %1278 }
0x140b   :  { %v1281_v54 = vpop.eup %1280  ;;  %v1020_v55 = vmul.f32 0.5, %v1279_v53 }
0x140c   :  { %1041 = vrot.lane.b32.xlu0 %v1281_v54, %s1322_s1  ;;  %v1283_v60 = vpop.eup %1282 }
0x140d   :  { %v1022_v56 = vadd.f32 0.5, %v1020_v55  ;;  %v1021_v59 = vmul.f32 0.5, %v1283_v60 }
0x140f   :  { %v1026_v57 = vmul.f32 %v1281_v54, %v1022_v56  ;;  %v1023_v62 = vadd.f32 0.5, %v1021_v59  ;;  %v1039_v4 = vmul.f32 %v1022_v56, %v925_v24 }
0x1411   :  { %1028 = vrot.lane.b32.xlu0 %v1026_v57, %s1323_s3  ;;  %v1025_v0 = vmul.f32 %v1023_v62, %v907_v18 }
0x147e   :  { %v1042_v61 = vpop.permute.xlu0 %1041 }
0x147f   :  { %v1044_v63 = vmul.f32 %v1042_v61, %v1022_v56 }
0x1481   :  { %1046 = vrot.lane.b32.xlu1 %v1044_v63, %s1323_s3 }
0x1483   :  { %v1029_v2 = vpop.permute.xlu0 %1028 }
0x1484   :  { %v1031_v3 = vadd.f32 %v1029_v2, %v1025_v0 }
0x1486   :  { %1284 = vtanh.f32 %v1031_v3 }
0x1493   :  { %v1285_v5 = vpop.eup %1284 }
0x1494   :  { %1034 = vrot.lane.b32.xlu0 %v1285_v5, %s1323_s3 }
0x14f3   :  { %v1047_v26 = vpop.permute.xlu1 %1046 }
0x14f4   :  { %v1049_v15 = vadd.f32 %v1047_v26, %v1039_v4 }
0x14f6   :  { %1286 = vtanh.f32 %v1049_v15 }
0x1503   :  { %v1287_v21 = vpop.eup %1286 }
0x1504   :  { %1052 = vrot.lane.b32.xlu1 %v1287_v21, %s1323_s3 }
0x1506   :  { %v1035_v6 = vpop.permute.xlu0 %1034 }
0x1507   :  { %v1037_v9 = vmul.f32 %v1035_v6, %v1023_v62 }
0x1509   :  { %1038 = vst.msk [vmem:[#allocation2] sm:$0x3] %vm295_vm5, %v1037_v9 }
0x1576   :  { %v1053_v22 = vpop.permute.xlu1 %1052 }
0x1577   :  { %v1055_v7 = vmul.f32 %v1053_v22, %v1022_v56 }
0x1579   :  { %1057 = vrot.lane.b32.xlu1 %v1055_v7, %s1322_s1 }
0x15eb   :  { %v1058_v8 = vpop.permute.xlu1 %1057 }
0x15ec   :  { %1060 = vst.msk [vmem:[#allocation2] sm:$0x3] %vm189_vm3, %v1058_v8 }
0x15f3   :  { %v1061_v10 = vld [vmem:[#allocation2] sm:$0x3] }
0x15f4   :  { %1201 = vmatmul.mubr.msk.f32.vlgmr.msra.gmra.mxu0 %vm198_vm4, %v1061_v10 }
0x16b4   :  { %v1131_v1 = vpop.f32.mrf.mxu0 }
0x16b5   :  { %v1132_v27 = vadd.f32 %v1131_v1, %v938_v46 }
0x16b6   :  { %v1133_v28 = vpop.f32.mrf.mxu0 }
0x16b7   :  { %v1136_v29 = vmul.f32 0.5, %v1132_v27  ;;  %v1134_v30 = vadd.f32 %v1133_v28, %v939_v49 }
0x16b9   :  { %1288 = vtanh.f32 %v1136_v29  ;;  %v1137_v38 = vmul.f32 0.5, %v1134_v30 }
0x16ba   :  { %1290 = vtanh.f32 %v1134_v30 }
0x16bb   :  { %1292 = vtanh.f32 %v1137_v38 }
0x16c6   :  { %v1289_v31 = vpop.eup %1288 }
0x16c7   :  { %v1140_v32 = vmul.f32 0.5, %v1289_v31  ;;  %v1291_v35 = vpop.eup %1290 }
0x16c8   :  { %v1293_v39 = vpop.eup %1292 }
0x16c9   :  { %v1142_v33 = vadd.f32 0.5, %v1140_v32  ;;  %v1141_v40 = vmul.f32 0.5, %v1293_v39 }
0x16cb   :  { %v1146_v36 = vmul.f32 %v1291_v35, %v1142_v33  ;;  %v1143_v41 = vadd.f32 0.5, %v1141_v40 }
0x16cd   :  { %1148 = vrot.lane.b32.xlu0 %v1146_v36, %s1323_s3  ;;  %v1145_v42 = vmul.f32 %v1143_v41, %v1031_v3 }
0x16d1   :  { %1164 = vrot.lane.b32.xlu0 %v1202_v37, %s1323_s3 }
0x173f   :  { %v1149_v11 = vpop.permute.xlu0 %1148 }
0x1740   :  { %v1151_v13 = vadd.f32 %v1149_v11, %v1145_v42 }
0x1742   :  { %1294 = vtanh.f32 %v1151_v13 }
0x1743   :  { %v1165_v18 = vpop.permute.xlu0 %1164 }
0x174f   :  { %v1295_v14 = vpop.eup %1294 }
0x1750   :  { %1154 = vrot.lane.b32.xlu1 %v1295_v14, %s1323_s3 }
0x17c2   :  { %v1155_v17 = vpop.permute.xlu1 %1154 }
0x17c3   :  { %v1157_v19 = vmul.f32 %v1155_v17, %v1143_v41 }
0x17c5   :  { %v1167_v20 = vmul.f32 %v1165_v18, %v1157_v19 }
0x17c7   :  { %1169 = vrot.lane.b32.xlu1 %v1167_v20, %s1324_s13 }
0x1839   :  { %v1170_v23 = vpop.permute.xlu1 %1169 }
0x183a   :  { %v1172_v24 = vsel %vm189_vm3, %v1170_v23, 0.0 }
0x183b   :  { %1173 = vadd.xlane.f32.xlu0 %v1172_v24 }
0x18c4   :  { %v1174_v34 = vpop.xlane.xlu0 %1173 }
0x18c5   :  { %v1182_v16 = vadd.f32 %v1203_v25, %v1174_v34 }
0x18c7   :  { %1184 = vst.msk [vmem:[%s1691_s6] sm:$0x3] %vm1183_vm6, %v1182_v16 }
0x18c8   :  { %1189 = vsyncpa [#allocation5], 1 }

</bundles_post_ra>
